<compile_context>
chip_gen: v6e
topology: v6e:2x2x1
jax: 0.10.0
libtpu: 0.0.40
codegen_flags: <defaults>
</compile_context>

<pallas_src>
import functools

import jax
import jax.numpy as jnp
from jax.experimental import pallas as pl
from jax.experimental.pallas import tpu as pltpu


def _axial_dw_kernel(wh_ref, ww_ref, b_ref, x_ref, o_ref, xp_ref, *,
                     H, W, h_offsets, w_offsets, add_identity, lh, lw_pad):
    """One (channel-tile, batch) block: y = x + conv_h(x) + conv_w(x).

    Shapes (channels-last, C_tile on lanes):
      wh_ref: (nh, C_tile) f32     ww_ref: (nw, C_tile) f32
      b_ref : (1, 1, C_tile) f32   (bh + bw)
      x_ref : (H, W, C_tile)       o_ref : (H, W, C_tile)
      xp_ref: (Hp, Wp, C_tile) VMEM scratch (zero-padded slab, W-pad 8-aligned)
    """
    Hp, Wp, Ct = xp_ref.shape
    dt = xp_ref.dtype

    xc = x_ref[...]                                      # (H, W, Ct)

    # ---- fused 'same' padding: zero only the halo border, drop xc in. ------
    if lw_pad > 0:                                       # left halo (full height)
        xp_ref[:, :lw_pad, :] = jnp.zeros((Hp, lw_pad, Ct), dt)
    right = Wp - (lw_pad + W)
    if right > 0:                                        # right halo (full height)
        xp_ref[:, lw_pad + W:, :] = jnp.zeros((Hp, right, Ct), dt)
    if lh > 0:                                           # top halo
        xp_ref[:lh, lw_pad:lw_pad + W, :] = jnp.zeros((lh, W, Ct), dt)
    bot = Hp - (lh + H)
    if bot > 0:                                          # bottom halo
        xp_ref[lh + H:, lw_pad:lw_pad + W, :] = jnp.zeros((bot, W, Ct), dt)
    xp_ref[lh:lh + H, lw_pad:lw_pad + W, :] = xc         # 8-aligned interior store

    # ---- accumulate: bias (+ identity only when it could not be folded). ---
    acc = jnp.broadcast_to(b_ref[...], (H, W, Ct)).astype(jnp.float32)
    if add_identity:
        acc = acc + xc.astype(jnp.float32)

    # Depthwise conv along H: vertically shifted slabs (aligned W offset).
    for t, off in enumerate(h_offsets):
        src = xc if off == lh else xp_ref[off:off + H, lw_pad:lw_pad + W, :]
        acc = acc + wh_ref[t] * src

    # Depthwise conv along W: horizontally (sublane) shifted slabs.
    for t, off in enumerate(w_offsets):
        src = xc if off == lw_pad else xp_ref[lh:lh + H, off:off + W, :]
        acc = acc + ww_ref[t] * src

    o_ref[...] = acc.astype(o_ref.dtype)


def _pick_c_tile(C, H, W, itemsize, target_bytes=4 * 1024 * 1024):
    """Lane-dense channel tile (multiple of 128 when possible), ~4 MiB blocks."""
    def blk(ct):
        return H * W * ct * itemsize

    if C % 128 == 0:
        ct = 128
        while C % (2 * ct) == 0 and blk(2 * ct) <= target_bytes:
            ct *= 2
        return ct
    # C not a multiple of 128: largest divisor of C with a bounded block size.
    if blk(C) <= 2 * target_bytes:
        return C
    for dvar in range(C - 1, 0, -1):
        if C % dvar == 0 and blk(dvar) <= 2 * target_bytes:
            return dvar
    return 1


def axial_dw_nhwc(x, wh, ww, bh, bw, dilation=1, c_tile=None):
    """Channels-last core.  x: (B,H,W,C); wh: (kh,C); ww: (kw,C); bh,bw: (C,)."""
    B, H, W, C = x.shape
    kh, kw = wh.shape[0], ww.shape[0]
    d = int(dilation)
    ph, pw = d * (kh - 1), d * (kw - 1)
    lh, lw = ph // 2, pw // 2              # PyTorch 'same': left pad = total // 2
    lw_pad = ((lw + 7) // 8) * 8           # sublane-aligned left pad
    Hp = H + ph
    Wp = ((lw_pad + W + (pw - lw) + 7) // 8) * 8

    # --- fold identity / zero-shift center taps into the weights. ------------
    whf = wh.astype(jnp.float32)
    wwf = ww.astype(jnp.float32)
    add_identity = True
    if kh % 2 == 1:
        whf = whf.at[kh // 2].add(1.0)
        add_identity = False
    elif kw % 2 == 1:
        wwf = wwf.at[kw // 2].add(1.0)
        add_identity = False
    w_taps = list(range(kw))
    if kh % 2 == 1 and kw % 2 == 1 and kw > 1:
        # W center tap is also a zero shift: fold it into the H center tap.
        whf = whf.at[kh // 2].add(wwf[kw // 2])
        w_taps.remove(kw // 2)
        wwf = wwf[jnp.asarray(w_taps)]

    h_offsets = tuple(t * d for t in range(kh))
    w_offsets = tuple(lw_pad - lw + t * d for t in w_taps)
    b3 = (bh + bw).astype(jnp.float32).reshape(1, 1, C)

    if c_tile is None:
        c_tile = _pick_c_tile(C, H, W, x.dtype.itemsize)
    assert C % c_tile == 0, "c_tile must divide C"

    # --- VMEM budget: clamp to the chip, shrink c_tile if needed. ------------
    cap = 64 * 1024 * 1024
    try:
        cap = int(getattr(pltpu.get_tpu_info(), "vmem_capacity_bytes", cap)) or cap
    except Exception:
        pass

    def vmem_est(ct):
        blk = H * W * ct * x.dtype.itemsize
        scr = Hp * Wp * ct * x.dtype.itemsize
        wts = (len(h_offsets) + len(w_offsets) + 1) * ct * 4 * 2
        return 4 * blk + scr + wts + (1 << 20)

    while vmem_est(c_tile) > int(0.8 * cap) and c_tile % 256 == 0:
        c_tile //= 2                       # stays a multiple of 128, divides C
    vmem_limit = int(min(max(vmem_est(c_tile), 16 * 1024 * 1024),
                         int(0.85 * cap)))

    kernel = functools.partial(
        _axial_dw_kernel, H=H, W=W, h_offsets=h_offsets, w_offsets=w_offsets,
        add_identity=add_identity, lh=lh, lw_pad=lw_pad)

    return pl.pallas_call(
        kernel,
        out_shape=jax.ShapeDtypeStruct((B, H, W, C), x.dtype),
        grid=(C // c_tile, B),             # weights resident across inner B axis
        in_specs=[
            pl.BlockSpec((kh, c_tile), lambda c, b: (0, c)),               # wh
            pl.BlockSpec((len(w_offsets), c_tile), lambda c, b: (0, c)),   # ww
            pl.BlockSpec((1, 1, c_tile), lambda c, b: (0, 0, c)),          # bias
            pl.BlockSpec((None, H, W, c_tile), lambda c, b: (b, 0, 0, c)),
        ],
        out_specs=pl.BlockSpec((None, H, W, c_tile), lambda c, b: (b, 0, 0, c)),
        scratch_shapes=[pltpu.VMEM((Hp, Wp, c_tile), x.dtype)],
        compiler_params=pltpu.CompilerParams(
            dimension_semantics=("parallel", "parallel"),
            vmem_limit_bytes=vmem_limit),
    )(whf, wwf, b3, x)


def axial_dw(x, wh, bh, ww, bw, dilation=1):
    """PyTorch-layout entry point.

    x: (B, C, H, W); wh: (C, kh); bh: (C,); ww: (C, kw); bw: (C,).
    The NCHW<->NHWC transposes are layout plumbing; channels-last callers
    should call axial_dw_nhwc directly and skip them.
    """
    x_nhwc = jnp.transpose(x, (0, 2, 3, 1))
    y_nhwc = axial_dw_nhwc(x_nhwc, wh.T, ww.T, bh, bw, dilation)
    return jnp.transpose(y_nhwc, (0, 3, 1, 2))


def ref_axial_dw(x, wh, bh, ww, bw, dilation=1):
    """Pure-JAX reference using grouped conv (matches PyTorch Conv2d 'same')."""
    C = x.shape[1]
    kh, kw = wh.shape[1], ww.shape[1]
    wh4 = wh.reshape(C, 1, kh, 1)      # OIHW, groups=C -> I = 1
    ww4 = ww.reshape(C, 1, 1, kw)
    ph = dilation * (kh - 1)
    pw = dilation * (kw - 1)

    def conv(inp, w, pad):
        return jax.lax.conv_general_dilated(
            inp, w, window_strides=(1, 1), padding=pad,
            rhs_dilation=(dilation, dilation),
            dimension_numbers=("NCHW", "OIHW", "NCHW"),
            feature_group_count=C)

    yh = conv(x, wh4, ((ph // 2, ph - ph // 2), (0, 0))) + bh.reshape(1, C, 1, 1)
    yw = conv(x, ww4, ((0, 0), (pw // 2, pw - pw // 2))) + bw.reshape(1, C, 1, 1)
    return x + yh + yw


def _make_params(key, C, kh, kw):
    k1, k2, k3, k4 = jax.random.split(key, 4)
    wh = jax.random.uniform(k1, (C, kh), jnp.float32, -1.0, 1.0) / jnp.sqrt(kh)
    bh = jax.random.uniform(k2, (C,), jnp.float32, -1.0, 1.0) / jnp.sqrt(kh)
    ww = jax.random.uniform(k3, (C, kw), jnp.float32, -1.0, 1.0) / jnp.sqrt(kw)
    bw = jax.random.uniform(k4, (C,), jnp.float32, -1.0, 1.0) / jnp.sqrt(kw)
    return wh, bh, ww, bw


if __name__ == "__main__":
    key = jax.random.PRNGKey(0)

    # Test 1: the module's default-ish config (mixer_kernel=(7,7)).
    B, C, H, W = 2, 4, 16, 16
    kh, kw = 7, 7
    kx, kp = jax.random.split(key)
    x = jax.random.normal(kx, (B, C, H, W), dtype=jnp.float32)
    wh, bh, ww, bw = _make_params(kp, C, kh, kw)

    y = jax.block_until_ready(axial_dw(x, wh, bh, ww, bw, 1))
    y_ref = jax.block_until_ready(ref_axial_dw(x, wh, bh, ww, bw, 1))
    assert y.shape == (B, C, H, W) and y.dtype == x.dtype
    assert jnp.allclose(y, y_ref, atol=1e-5, rtol=1e-5), "mismatch (7,7)"

    # Test 2: asymmetric odd kernel + dilation.
    B2, C2 = 2, 8
    kh2, kw2, dil2 = 3, 5, 2
    kx2, kp2 = jax.random.split(kp)
    x2 = jax.random.normal(kx2, (B2, C2, H, W), dtype=jnp.float32)
    wh2, bh2, ww2, bw2 = _make_params(kp2, C2, kh2, kw2)

    y2 = jax.block_until_ready(axial_dw(x2, wh2, bh2, ww2, bw2, dil2))
    y2_ref = jax.block_until_ready(ref_axial_dw(x2, wh2, bh2, ww2, bw2, dil2))
    assert jnp.allclose(y2, y2_ref, atol=1e-5, rtol=1e-5), "mismatch (3,5,d=2)"

    # Test 3: even H kernel (identity folds into the odd W kernel instead).
    kh3, kw3 = 2, 3
    kx3, kp3 = jax.random.split(kp2)
    x3 = jax.random.normal(kx3, (B2, C2, H, W), dtype=jnp.float32)
    wh3, bh3, ww3, bw3 = _make_params(kp3, C2, kh3, kw3)

    y3 = jax.block_until_ready(axial_dw(x3, wh3, bh3, ww3, bw3, 1))
    y3_ref = jax.block_until_ready(ref_axial_dw(x3, wh3, bh3, ww3, bw3, 1))
    assert jnp.allclose(y3, y3_ref, atol=1e-5, rtol=1e-5), "mismatch (2,3)"

    print("KERNEL_OK")
</pallas_src>

<mosaic_0001>
module attributes {stable_mosaic.version = 11 : i64} {
  func.func @_axial_dw_kernel(%arg0: i32, %arg1: i32, %arg2: memref<7x4xf32, #tpu.memory_space<vmem>>, %arg3: memref<6x4xf32, #tpu.memory_space<vmem>>, %arg4: memref<1x1x4xf32, #tpu.memory_space<vmem>>, %arg5: memref<1x16x16x4xf32, #tpu.memory_space<vmem>>, %arg6: memref<1x16x16x4xf32, #tpu.memory_space<vmem>>, %arg7: memref<22x32x4xf32, #tpu.memory_space<vmem>>) attributes {dimension_semantics = [#tpu.dimension_semantics<parallel>, #tpu.dimension_semantics<parallel>], iteration_bounds = array<i64: 1, 2>, scalar_prefetch = 0 : i64, scratch_operands = 1 : i64, tpu.core_type = #tpu.core_type<tc>, window_params = [{transform_indices = @transform_0, window_bounds = array<i64: 7, 4>}, {transform_indices = @transform_1, window_bounds = array<i64: 6, 4>}, {transform_indices = @transform_2, window_bounds = array<i64: 1, 1, 4>}, {transform_indices = @transform_3, window_bounds = array<i64: 1, 16, 16, 4>}, {transform_indices = @transform_4, window_bounds = array<i64: 1, 16, 16, 4>}]} {
    %c0 = arith.constant 0 : index
    %c0_0 = arith.constant 0 : index
    %c0_1 = arith.constant 0 : index
    %c0_2 = arith.constant 0 : index
    %0 = vector.load %arg5[%c0, %c0_0, %c0_1, %c0_2] : memref<1x16x16x4xf32, #tpu.memory_space<vmem>>, vector<1x16x16x4xf32>
    %1 = vector.shape_cast %0 : vector<1x16x16x4xf32> to vector<16x16x4xf32>
    %cst = arith.constant 0.000000e+00 : f32
    %2 = vector.broadcast %cst : f32 to vector<22x8x4xf32>
    %c0_3 = arith.constant 0 : index
    %c0_4 = arith.constant 0 : index
    %c0_5 = arith.constant 0 : index
    %3 = vector.load %arg7[%c0_3, %c0_4, %c0_5] : memref<22x32x4xf32, #tpu.memory_space<vmem>>, vector<22x8x4xf32>
    tpu.vector_store %arg7[%c0_3, %c0_4, %c0_5], %2 {strides = array<i32>} : memref<22x32x4xf32, #tpu.memory_space<vmem>>, vector<22x8x4xf32>,
    %cst_6 = arith.constant 0.000000e+00 : f32
    %4 = vector.broadcast %cst_6 : f32 to vector<22x8x4xf32>
    %c0_7 = arith.constant 0 : index
    %c24 = arith.constant 24 : index
    %c0_8 = arith.constant 0 : index
    %5 = vector.load %arg7[%c0_7, %c24, %c0_8] : memref<22x32x4xf32, #tpu.memory_space<vmem>>, vector<22x8x4xf32>
    tpu.vector_store %arg7[%c0_7, %c24, %c0_8], %4 {strides = array<i32>} : memref<22x32x4xf32, #tpu.memory_space<vmem>>, vector<22x8x4xf32>,
    %cst_9 = arith.constant 0.000000e+00 : f32
    %6 = vector.broadcast %cst_9 : f32 to vector<3x16x4xf32>
    %c0_10 = arith.constant 0 : index
    %c8 = arith.constant 8 : index
    %c0_11 = arith.constant 0 : index
    %7 = vector.load %arg7[%c0_10, %c8, %c0_11] : memref<22x32x4xf32, #tpu.memory_space<vmem>>, vector<3x16x4xf32>
    tpu.vector_store %arg7[%c0_10, %c8, %c0_11], %6 {strides = array<i32>} : memref<22x32x4xf32, #tpu.memory_space<vmem>>, vector<3x16x4xf32>,
    %cst_12 = arith.constant 0.000000e+00 : f32
    %8 = vector.broadcast %cst_12 : f32 to vector<3x16x4xf32>
    %c19 = arith.constant 19 : index
    %c8_13 = arith.constant 8 : index
    %c0_14 = arith.constant 0 : index
    %9 = vector.load %arg7[%c19, %c8_13, %c0_14] : memref<22x32x4xf32, #tpu.memory_space<vmem>>, vector<3x16x4xf32>
    tpu.vector_store %arg7[%c19, %c8_13, %c0_14], %8 {strides = array<i32>} : memref<22x32x4xf32, #tpu.memory_space<vmem>>, vector<3x16x4xf32>,
    %c3 = arith.constant 3 : index
    %c8_15 = arith.constant 8 : index
    %c0_16 = arith.constant 0 : index
    %10 = vector.load %arg7[%c3, %c8_15, %c0_16] : memref<22x32x4xf32, #tpu.memory_space<vmem>>, vector<16x16x4xf32>
    tpu.vector_store %arg7[%c3, %c8_15, %c0_16], %1 {strides = array<i32>} : memref<22x32x4xf32, #tpu.memory_space<vmem>>, vector<16x16x4xf32>,
    %c0_17 = arith.constant 0 : index
    %c0_18 = arith.constant 0 : index
    %c0_19 = arith.constant 0 : index
    %11 = vector.load %arg4[%c0_17, %c0_18, %c0_19] : memref<1x1x4xf32, #tpu.memory_space<vmem>>, vector<1x1x4xf32>
    %12 = vector.shape_cast %11 : vector<1x1x4xf32> to vector<1x1x4xf32>
    %13 = vector.broadcast %12 : vector<1x1x4xf32> to vector<16x16x4xf32>
    %c0_20 = arith.constant 0 : index
    %c8_21 = arith.constant 8 : index
    %c0_22 = arith.constant 0 : index
    %14 = vector.load %arg7[%c0_20, %c8_21, %c0_22] : memref<22x32x4xf32, #tpu.memory_space<vmem>>, vector<16x16x4xf32>
    %c0_23 = arith.constant 0 : index
    %c0_24 = arith.constant 0 : index
    %15 = vector.load %arg2[%c0_23, %c0_24] : memref<7x4xf32, #tpu.memory_space<vmem>>, vector<1x4xf32>
    %16 = vector.shape_cast %15 : vector<1x4xf32> to vector<4xf32>
    %17 = vector.shape_cast %16 : vector<4xf32> to vector<1x1x4xf32>
    %18 = vector.broadcast %17 : vector<1x1x4xf32> to vector<16x16x4xf32>
    %19 = arith.mulf %18, %14 : vector<16x16x4xf32>
    %20 = arith.addf %13, %19 : vector<16x16x4xf32>
    %c1 = arith.constant 1 : index
    %c8_25 = arith.constant 8 : index
    %c0_26 = arith.constant 0 : index
    %21 = vector.load %arg7[%c1, %c8_25, %c0_26] : memref<22x32x4xf32, #tpu.memory_space<vmem>>, vector<16x16x4xf32>
    %c1_27 = arith.constant 1 : index
    %c0_28 = arith.constant 0 : index
    %22 = vector.load %arg2[%c1_27, %c0_28] : memref<7x4xf32, #tpu.memory_space<vmem>>, vector<1x4xf32>
    %23 = vector.shape_cast %22 : vector<1x4xf32> to vector<4xf32>
    %24 = vector.shape_cast %23 : vector<4xf32> to vector<1x1x4xf32>
    %25 = vector.broadcast %24 : vector<1x1x4xf32> to vector<16x16x4xf32>
    %26 = arith.mulf %25, %21 : vector<16x16x4xf32>
    %27 = arith.addf %20, %26 : vector<16x16x4xf32>
    %c2 = arith.constant 2 : index
    %c8_29 = arith.constant 8 : index
    %c0_30 = arith.constant 0 : index
    %28 = vector.load %arg7[%c2, %c8_29, %c0_30] : memref<22x32x4xf32, #tpu.memory_space<vmem>>, vector<16x16x4xf32>
    %c2_31 = arith.constant 2 : index
    %c0_32 = arith.constant 0 : index
    %29 = vector.load %arg2[%c2_31, %c0_32] : memref<7x4xf32, #tpu.memory_space<vmem>>, vector<1x4xf32>
    %30 = vector.shape_cast %29 : vector<1x4xf32> to vector<4xf32>
    %31 = vector.shape_cast %30 : vector<4xf32> to vector<1x1x4xf32>
    %32 = vector.broadcast %31 : vector<1x1x4xf32> to vector<16x16x4xf32>
    %33 = arith.mulf %32, %28 : vector<16x16x4xf32>
    %34 = arith.addf %27, %33 : vector<16x16x4xf32>
    %c3_33 = arith.constant 3 : index
    %c0_34 = arith.constant 0 : index
    %35 = vector.load %arg2[%c3_33, %c0_34] : memref<7x4xf32, #tpu.memory_space<vmem>>, vector<1x4xf32>
    %36 = vector.shape_cast %35 : vector<1x4xf32> to vector<4xf32>
    %37 = vector.shape_cast %36 : vector<4xf32> to vector<1x1x4xf32>
    %38 = vector.broadcast %37 : vector<1x1x4xf32> to vector<16x16x4xf32>
    %39 = arith.mulf %38, %1 : vector<16x16x4xf32>
    %40 = arith.addf %34, %39 : vector<16x16x4xf32>
    %c4 = arith.constant 4 : index
    %c8_35 = arith.constant 8 : index
    %c0_36 = arith.constant 0 : index
    %41 = vector.load %arg7[%c4, %c8_35, %c0_36] : memref<22x32x4xf32, #tpu.memory_space<vmem>>, vector<16x16x4xf32>
    %c4_37 = arith.constant 4 : index
    %c0_38 = arith.constant 0 : index
    %42 = vector.load %arg2[%c4_37, %c0_38] : memref<7x4xf32, #tpu.memory_space<vmem>>, vector<1x4xf32>
    %43 = vector.shape_cast %42 : vector<1x4xf32> to vector<4xf32>
    %44 = vector.shape_cast %43 : vector<4xf32> to vector<1x1x4xf32>
    %45 = vector.broadcast %44 : vector<1x1x4xf32> to vector<16x16x4xf32>
    %46 = arith.mulf %45, %41 : vector<16x16x4xf32>
    %47 = arith.addf %40, %46 : vector<16x16x4xf32>
    %c5 = arith.constant 5 : index
    %c8_39 = arith.constant 8 : index
    %c0_40 = arith.constant 0 : index
    %48 = vector.load %arg7[%c5, %c8_39, %c0_40] : memref<22x32x4xf32, #tpu.memory_space<vmem>>, vector<16x16x4xf32>
    %c5_41 = arith.constant 5 : index
    %c0_42 = arith.constant 0 : index
    %49 = vector.load %arg2[%c5_41, %c0_42] : memref<7x4xf32, #tpu.memory_space<vmem>>, vector<1x4xf32>
    %50 = vector.shape_cast %49 : vector<1x4xf32> to vector<4xf32>
    %51 = vector.shape_cast %50 : vector<4xf32> to vector<1x1x4xf32>
    %52 = vector.broadcast %51 : vector<1x1x4xf32> to vector<16x16x4xf32>
    %53 = arith.mulf %52, %48 : vector<16x16x4xf32>
    %54 = arith.addf %47, %53 : vector<16x16x4xf32>
    %c6 = arith.constant 6 : index
    %c8_43 = arith.constant 8 : index
    %c0_44 = arith.constant 0 : index
    %55 = vector.load %arg7[%c6, %c8_43, %c0_44] : memref<22x32x4xf32, #tpu.memory_space<vmem>>, vector<16x16x4xf32>
    %c6_45 = arith.constant 6 : index
    %c0_46 = arith.constant 0 : index
    %56 = vector.load %arg2[%c6_45, %c0_46] : memref<7x4xf32, #tpu.memory_space<vmem>>, vector<1x4xf32>
    %57 = vector.shape_cast %56 : vector<1x4xf32> to vector<4xf32>
    %58 = vector.shape_cast %57 : vector<4xf32> to vector<1x1x4xf32>
    %59 = vector.broadcast %58 : vector<1x1x4xf32> to vector<16x16x4xf32>
    %60 = arith.mulf %59, %55 : vector<16x16x4xf32>
    %61 = arith.addf %54, %60 : vector<16x16x4xf32>
    %c3_47 = arith.constant 3 : index
    %c5_48 = arith.constant 5 : index
    %c0_49 = arith.constant 0 : index
    %62 = vector.load %arg7[%c3_47, %c5_48, %c0_49] : memref<22x32x4xf32, #tpu.memory_space<vmem>>, vector<16x16x4xf32>
    %c0_50 = arith.constant 0 : index
    %c0_51 = arith.constant 0 : index
    %63 = vector.load %arg3[%c0_50, %c0_51] : memref<6x4xf32, #tpu.memory_space<vmem>>, vector<1x4xf32>
    %64 = vector.shape_cast %63 : vector<1x4xf32> to vector<4xf32>
    %65 = vector.shape_cast %64 : vector<4xf32> to vector<1x1x4xf32>
    %66 = vector.broadcast %65 : vector<1x1x4xf32> to vector<16x16x4xf32>
    %67 = arith.mulf %66, %62 : vector<16x16x4xf32>
    %68 = arith.addf %61, %67 : vector<16x16x4xf32>
    %c3_52 = arith.constant 3 : index
    %c6_53 = arith.constant 6 : index
    %c0_54 = arith.constant 0 : index
    %69 = vector.load %arg7[%c3_52, %c6_53, %c0_54] : memref<22x32x4xf32, #tpu.memory_space<vmem>>, vector<16x16x4xf32>
    %c1_55 = arith.constant 1 : index
    %c0_56 = arith.constant 0 : index
    %70 = vector.load %arg3[%c1_55, %c0_56] : memref<6x4xf32, #tpu.memory_space<vmem>>, vector<1x4xf32>
    %71 = vector.shape_cast %70 : vector<1x4xf32> to vector<4xf32>
    %72 = vector.shape_cast %71 : vector<4xf32> to vector<1x1x4xf32>
    %73 = vector.broadcast %72 : vector<1x1x4xf32> to vector<16x16x4xf32>
    %74 = arith.mulf %73, %69 : vector<16x16x4xf32>
    %75 = arith.addf %68, %74 : vector<16x16x4xf32>
    %c3_57 = arith.constant 3 : index
    %c7 = arith.constant 7 : index
    %c0_58 = arith.constant 0 : index
    %76 = vector.load %arg7[%c3_57, %c7, %c0_58] : memref<22x32x4xf32, #tpu.memory_space<vmem>>, vector<16x16x4xf32>
    %c2_59 = arith.constant 2 : index
    %c0_60 = arith.constant 0 : index
    %77 = vector.load %arg3[%c2_59, %c0_60] : memref<6x4xf32, #tpu.memory_space<vmem>>, vector<1x4xf32>
    %78 = vector.shape_cast %77 : vector<1x4xf32> to vector<4xf32>
    %79 = vector.shape_cast %78 : vector<4xf32> to vector<1x1x4xf32>
    %80 = vector.broadcast %79 : vector<1x1x4xf32> to vector<16x16x4xf32>
    %81 = arith.mulf %80, %76 : vector<16x16x4xf32>
    %82 = arith.addf %75, %81 : vector<16x16x4xf32>
    %c3_61 = arith.constant 3 : index
    %c9 = arith.constant 9 : index
    %c0_62 = arith.constant 0 : index
    %83 = vector.load %arg7[%c3_61, %c9, %c0_62] : memref<22x32x4xf32, #tpu.memory_space<vmem>>, vector<16x16x4xf32>
    %c3_63 = arith.constant 3 : index
    %c0_64 = arith.constant 0 : index
    %84 = vector.load %arg3[%c3_63, %c0_64] : memref<6x4xf32, #tpu.memory_space<vmem>>, vector<1x4xf32>
    %85 = vector.shape_cast %84 : vector<1x4xf32> to vector<4xf32>
    %86 = vector.shape_cast %85 : vector<4xf32> to vector<1x1x4xf32>
    %87 = vector.broadcast %86 : vector<1x1x4xf32> to vector<16x16x4xf32>
    %88 = arith.mulf %87, %83 : vector<16x16x4xf32>
    %89 = arith.addf %82, %88 : vector<16x16x4xf32>
    %c3_65 = arith.constant 3 : index
    %c10 = arith.constant 10 : index
    %c0_66 = arith.constant 0 : index
    %90 = vector.load %arg7[%c3_65, %c10, %c0_66] : memref<22x32x4xf32, #tpu.memory_space<vmem>>, vector<16x16x4xf32>
    %c4_67 = arith.constant 4 : index
    %c0_68 = arith.constant 0 : index
    %91 = vector.load %arg3[%c4_67, %c0_68] : memref<6x4xf32, #tpu.memory_space<vmem>>, vector<1x4xf32>
    %92 = vector.shape_cast %91 : vector<1x4xf32> to vector<4xf32>
    %93 = vector.shape_cast %92 : vector<4xf32> to vector<1x1x4xf32>
    %94 = vector.broadcast %93 : vector<1x1x4xf32> to vector<16x16x4xf32>
    %95 = arith.mulf %94, %90 : vector<16x16x4xf32>
    %96 = arith.addf %89, %95 : vector<16x16x4xf32>
    %c3_69 = arith.constant 3 : index
    %c11 = arith.constant 11 : index
    %c0_70 = arith.constant 0 : index
    %97 = vector.load %arg7[%c3_69, %c11, %c0_70] : memref<22x32x4xf32, #tpu.memory_space<vmem>>, vector<16x16x4xf32>
    %c5_71 = arith.constant 5 : index
    %c0_72 = arith.constant 0 : index
    %98 = vector.load %arg3[%c5_71, %c0_72] : memref<6x4xf32, #tpu.memory_space<vmem>>, vector<1x4xf32>
    %99 = vector.shape_cast %98 : vector<1x4xf32> to vector<4xf32>
    %100 = vector.shape_cast %99 : vector<4xf32> to vector<1x1x4xf32>
    %101 = vector.broadcast %100 : vector<1x1x4xf32> to vector<16x16x4xf32>
    %102 = arith.mulf %101, %97 : vector<16x16x4xf32>
    %103 = arith.addf %96, %102 : vector<16x16x4xf32>
    %c0_73 = arith.constant 0 : index
    %c0_74 = arith.constant 0 : index
    %c0_75 = arith.constant 0 : index
    %c0_76 = arith.constant 0 : index
    %104 = vector.load %arg6[%c0_73, %c0_74, %c0_75, %c0_76] : memref<1x16x16x4xf32, #tpu.memory_space<vmem>>, vector<1x16x16x4xf32>
    %105 = vector.shape_cast %104 : vector<1x16x16x4xf32> to vector<16x16x4xf32>
    %106 = vector.shape_cast %103 : vector<16x16x4xf32> to vector<1x16x16x4xf32>
    tpu.vector_store %arg6[%c0_73, %c0_74, %c0_75, %c0_76], %106 {strides = array<i32>} : memref<1x16x16x4xf32, #tpu.memory_space<vmem>>, vector<1x16x16x4xf32>,
    return
  }
  func.func @transform_0(%arg0: i32, %arg1: i32) -> (i32, i32) {
    %c0_i32 = arith.constant 0 : i32
    %c0_i32_0 = arith.constant 0 : i32
    return %c0_i32, %arg0 : i32, i32
  }
  func.func @transform_1(%arg0: i32, %arg1: i32) -> (i32, i32) {
    %c0_i32 = arith.constant 0 : i32
    %c0_i32_0 = arith.constant 0 : i32
    return %c0_i32, %arg0 : i32, i32
  }
  func.func @transform_2(%arg0: i32, %arg1: i32) -> (i32, i32, i32) {
    %c0_i32 = arith.constant 0 : i32
    %c0_i32_0 = arith.constant 0 : i32
    %c0_i32_1 = arith.constant 0 : i32
    return %c0_i32, %c0_i32_0, %arg0 : i32, i32, i32
  }
  func.func @transform_3(%arg0: i32, %arg1: i32) -> (i32, i32, i32, i32) {
    %c0_i32 = arith.constant 0 : i32
    %c0_i32_0 = arith.constant 0 : i32
    %c0_i32_1 = arith.constant 0 : i32
    return %arg1, %c0_i32, %c0_i32_0, %arg0 : i32, i32, i32, i32
  }
  func.func @transform_4(%arg0: i32, %arg1: i32) -> (i32, i32, i32, i32) {
    %c0_i32 = arith.constant 0 : i32
    %c0_i32_0 = arith.constant 0 : i32
    %c0_i32_1 = arith.constant 0 : i32
    return %arg1, %c0_i32, %c0_i32_0, %arg0 : i32, i32, i32, i32
  }
}

</mosaic_0001>

<bundles_post_ra>
// kernel: tpu_custom_call.1
= control target key start
LH: loop header
LB: loop body
LE: loop exit
PB: predicated region body
PF: predicated region fallthrough
CT: control target
= control target key end

     0   :  { %s1965_s15 = smov 0   ;;  %s1967_s16 = smov 0   ;;  %s3202_s0 = inlined_call_operand.vmem [shape: f32[7,4], index: 0, kind: input, shape index: {}]   ;;  %s3203_s1 = inlined_call_operand.vmem [shape: f32[6,4], index: 1, kind: input, shape index: {}]   ;;  %s3204_s2 = inlined_call_operand.vmem [shape: f32[1,1,4], index: 2, kind: input, shape index: {}]   ;;  %s3205_s3 = inlined_call_operand.vmem [shape: f32[2,16,16,4], index: 3, kind: input, shape index: {}]   ;;  %s3206_s4 = inlined_call_operand.vmem [shape: f32[2,16,16,4], index: 4, kind: output, shape index: {}]  }
   0x1   :  { %s1969_s17 = smov 0  }
   0x2 LB: > { %s23_s18 = sadd.s32 1, %s1933_s16  ;;  %p1858_p0 = scmp.ge.s32.totalorder %s1937_s17, 1  ;;  %s1937_s17 = sphi %s1969_s17, %s14_s17   ;;  %s1933_s16 = sphi %s1967_s16, %s3268_s16   ;;  %s1929_s15 = sphi %s1965_s15, %s3267_s15  }
   0x3   : > { %p24_p1 = scmp.ge.s32.totalorder %s23_s18, 2  ;;  %p207_p2 = scmp.lt.s32.totalorder %s1937_s17, 3 }
   0x5   : > { %s3270_s18 = smov (%p24_p1, %s23_s18), 0  ;;  %p208_p3 = pnand %p1858_p0, %p207_p2 }
   0x7   : > { %211 = sbr.rel (%p208_p3) target bundleno = 255 (0xff), region = 36 }
   0xc   : > { %vm309_vm0 = vcmask 31744   ;;  %p261_p4 = scmp.lt.s32.totalorder %s1929_s15, 1  ;;  %v1939_v0 = vmov 0.0   ;;  %v2046_v1 = vld [vmem:[%s3202_s0] ss:$0 sm:$0xff] }
   0xd   : > { %354 = vst.msk [vmem:[#allocation2 + $0x8] sm:$0xff] %vm309_vm0, %v1939_v0  ;;  %313 = vst.msk [vmem:[#allocation2 + $0x60] sm:$0xff] %vm309_vm0, %v1939_v0  ;;  %v2051_v2 = vld [vmem:[%s3202_s0 + $0x1] ss:$0 sm:$0xff]  ;;  %v2057_v4 = vld [vmem:[%s3204_s2] ss:$0 sm:$0xff] }
   0xe   : > { %314 = vst.msk [vmem:[#allocation2 + $0x80] sm:$0xff] %vm309_vm0, %v1939_v0  ;;  %315 = vst.msk [vmem:[#allocation2 + $0xa0] sm:$0xff] %vm309_vm0, %v1939_v0  ;;  %s3272_s15 = smov (!%p261_p4, %s1929_s15), 1  ;;  %v2074_v13 = vld [vmem:[%s3202_s0 + $0x2] ss:$0 sm:$0xff] }
   0xf   : > { %316 = vst.msk [vmem:[#allocation2 + $0xc0] sm:$0xff] %vm309_vm0, %v1939_v0  ;;  %317 = vst.msk [vmem:[#allocation2 + $0xe0] sm:$0xff] %vm309_vm0, %v1939_v0  ;;  %s1879_s19 = sshll.u32 %s3272_s15, 8  ;;  %v2086_v16 = vld [vmem:[%s3202_s0 + $0x3] ss:$0 sm:$0xff] }
  0x10   : > { %318 = vst.msk [vmem:[#allocation2 + $0x100] sm:$0xff] %vm309_vm0, %v1939_v0  ;;  %319 = vst.msk [vmem:[#allocation2 + $0x120] sm:$0xff] %vm309_vm0, %v1939_v0  ;;  %s2041_s22 = scalar_lea.vmem %s3205_s3, %s1879_s19  ;;  %s2710_s6 = scalar_lea.vmem %s3206_s4, %s1879_s19 }
  0x11   : > { %320 = vst.msk [vmem:[#allocation2 + $0x140] sm:$0xff] %vm309_vm0, %v1939_v0  ;;  %321 = vst.msk [vmem:[#allocation2 + $0x160] sm:$0xff] %vm309_vm0, %v1939_v0  ;;  %v277_v3 = vld [vmem:[%s2041_s22] sm:$0xff]  ;;  %v278_v5 = vld [vmem:[%s2041_s22 + $0x8] sm:$0xff] }
  0x12   : > { %322 = vst.msk [vmem:[#allocation2 + $0x180] sm:$0xff] %vm309_vm0, %v1939_v0  ;;  %323 = vst.msk [vmem:[#allocation2 + $0x1a0] sm:$0xff] %vm309_vm0, %v1939_v0  ;;  %v279_v6 = vld [vmem:[%s2041_s22 + $0x10] sm:$0xff]  ;;  %v280_v7 = vld [vmem:[%s2041_s22 + $0x18] sm:$0xff]  ;;  %v717_v46 = vmul.f32 %v2086_v16, %v277_v3  ;;  %v718_v47 = vmul.f32 %v2086_v16, %v278_v5 }
  0x13   : > { %324 = vst.msk [vmem:[#allocation2 + $0x1c0] sm:$0xff] %vm309_vm0, %v1939_v0  ;;  %325 = vst.msk [vmem:[#allocation2 + $0x1e0] sm:$0xff] %vm309_vm0, %v1939_v0  ;;  %v2066_v8 = vld [vmem:[%s2041_s22 + $0x20] sm:$0xff]  ;;  %v2069_v9 = vld [vmem:[%s2041_s22 + $0x28] sm:$0xff]  ;;  %v2158_v49 = vmul.f32 %v2086_v16, %v279_v6  ;;  %v2161_v51 = vmul.f32 %v2086_v16, %v280_v7 }
  0x14   : > { %326 = vst.msk [vmem:[#allocation2 + $0x200] sm:$0xff] %vm309_vm0, %v1939_v0  ;;  %327 = vst.msk [vmem:[#allocation2 + $0x220] sm:$0xff] %vm309_vm0, %v1939_v0  ;;  %v407_v10 = vld [vmem:[#allocation2 + $0x8] sm:$0xff]  ;;  %v2091_v22 = vld [vmem:[%s2041_s22 + $0x30] sm:$0xff]  ;;  %v2175_v56 = vmul.f32 %v2086_v16, %v2066_v8 }
  0x15   : > { %328 = vst.msk [vmem:[#allocation2 + $0x240] sm:$0xff] %vm309_vm0, %v1939_v0  ;;  %335 = vst.msk [vmem:[#allocation2 + $0x78] sm:$0xff] %vm309_vm0, %v1939_v0  ;;  %v444_v14 = vmul.f32 %v2046_v1, %v407_v10  ;;  %v2094_v23 = vld [vmem:[%s2041_s22 + $0x38] sm:$0xff]  ;;  %v2097_v24 = vld [vmem:[%s2041_s22 + $0x40] sm:$0xff] }
  0x16   : > { %336 = vst.msk [vmem:[#allocation2 + $0x98] sm:$0xff] %vm309_vm0, %v1939_v0  ;;  %337 = vst.msk [vmem:[#allocation2 + $0xb8] sm:$0xff] %vm309_vm0, %v1939_v0  ;;  %v2110_v29 = vld [vmem:[%s2041_s22 + $0x48] sm:$0xff]  ;;  %v2113_v30 = vld [vmem:[%s2041_s22 + $0x50] sm:$0xff] }
  0x17   : > { %338 = vst.msk [vmem:[#allocation2 + $0xd8] sm:$0xff] %vm309_vm0, %v1939_v0  ;;  %339 = vst.msk [vmem:[#allocation2 + $0xf8] sm:$0xff] %vm309_vm0, %v1939_v0  ;;  %v476_v25 = vadd.f32 %v2057_v4, %v444_v14  ;;  %v2116_v31 = vld [vmem:[%s2041_s22 + $0x58] sm:$0xff]  ;;  %v2129_v36 = vld [vmem:[%s2041_s22 + $0x60] sm:$0xff]  ;;  %v2213_v14 = vmul.f32 %v2086_v16, %v2091_v22 }
  0x18   : > { %340 = vst.msk [vmem:[#allocation2 + $0x118] sm:$0xff] %vm309_vm0, %v1939_v0  ;;  %341 = vst.msk [vmem:[#allocation2 + $0x138] sm:$0xff] %vm309_vm0, %v1939_v0  ;;  %v2132_v37 = vld [vmem:[%s2041_s22 + $0x68] sm:$0xff]  ;;  %v2135_v38 = vld [vmem:[%s2041_s22 + $0x70] sm:$0xff] }
  0x19   : > { %342 = vst.msk [vmem:[#allocation2 + $0x158] sm:$0xff] %vm309_vm0, %v1939_v0  ;;  %343 = vst.msk [vmem:[#allocation2 + $0x178] sm:$0xff] %vm309_vm0, %v1939_v0  ;;  %v2147_v43 = vld [vmem:[%s2041_s22 + $0x78] sm:$0xff]  ;;  %v2150_v44 = vld [vmem:[%s2041_s22 + $0x80] sm:$0xff] }
  0x1a   : > { %344 = vst.msk [vmem:[#allocation2 + $0x198] sm:$0xff] %vm309_vm0, %v1939_v0  ;;  %345 = vst.msk [vmem:[#allocation2 + $0x1b8] sm:$0xff] %vm309_vm0, %v1939_v0  ;;  %v2153_v45 = vld [vmem:[%s2041_s22 + $0x88] sm:$0xff]  ;;  %v2181_v61 = vld [vmem:[%s2041_s22 + $0x90] sm:$0xff] }
  0x1b   : > { %346 = vst.msk [vmem:[#allocation2 + $0x1d8] sm:$0xff] %vm309_vm0, %v1939_v0  ;;  %347 = vst.msk [vmem:[#allocation2 + $0x1f8] sm:$0xff] %vm309_vm0, %v1939_v0  ;;  %v2184_v62 = vld [vmem:[%s2041_s22 + $0x98] sm:$0xff]  ;;  %v2187_v63 = vld [vmem:[%s2041_s22 + $0xa0] sm:$0xff] }
  0x1c   : > { %348 = vst.msk [vmem:[#allocation2 + $0x218] sm:$0xff] %vm309_vm0, %v1939_v0  ;;  %349 = vst.msk [vmem:[#allocation2 + $0x238] sm:$0xff] %vm309_vm0, %v1939_v0  ;;  %v2204_v10 = vld [vmem:[%s2041_s22 + $0xb8] sm:$0xff] }
  0x1d   : > { %350 = vst.msk [vmem:[#allocation2 + $0x258] sm:$0xff] %vm309_vm0, %v1939_v0  ;;  %355 = vst.msk [vmem:[#allocation2 + $0x10] sm:$0xff] %vm309_vm0, %v1939_v0 }
  0x1e   : > { %356 = vst.msk [vmem:[#allocation2 + $0x28] sm:$0xff] %vm309_vm0, %v1939_v0  ;;  %357 = vst.msk [vmem:[#allocation2 + $0x30] sm:$0xff] %vm309_vm0, %v1939_v0 }
  0x1f   : > { %358 = vst.msk [vmem:[#allocation2 + $0x48] sm:$0xff] %vm309_vm0, %v1939_v0  ;;  %359 = vst.msk [vmem:[#allocation2 + $0x50] sm:$0xff] %vm309_vm0, %v1939_v0 }
  0x20   : > { %361 = vst.msk [vmem:[#allocation2 + $0x268] sm:$0xff] %vm309_vm0, %v1939_v0  ;;  %362 = vst.msk [vmem:[#allocation2 + $0x270] sm:$0xff] %vm309_vm0, %v1939_v0 }
  0x21   : > { %363 = vst.msk [vmem:[#allocation2 + $0x288] sm:$0xff] %vm309_vm0, %v1939_v0  ;;  %364 = vst.msk [vmem:[#allocation2 + $0x290] sm:$0xff] %vm309_vm0, %v1939_v0 }
  0x22   : > { %365 = vst.msk [vmem:[#allocation2 + $0x2a8] sm:$0xff] %vm309_vm0, %v1939_v0  ;;  %366 = vst.msk [vmem:[#allocation2 + $0x2b0] sm:$0xff] %vm309_vm0, %v1939_v0 }
  0x23   : > { %368 = vst.msk [vmem:[#allocation2 + $0x68] sm:$0xff] %vm309_vm0, %v277_v3  ;;  %369 = vst.msk [vmem:[#allocation2 + $0x70] sm:$0xff] %vm309_vm0, %v278_v5 }
  0x24   : > { %370 = vst.msk [vmem:[#allocation2 + $0x88] sm:$0xff] %vm309_vm0, %v279_v6  ;;  %371 = vst.msk [vmem:[#allocation2 + $0x90] sm:$0xff] %vm309_vm0, %v280_v7  ;;  %v408_v17 = vld [vmem:[#allocation2 + $0x10] sm:$0xff]  ;;  %v2198_v7 = vld [vmem:[%s2041_s22 + $0xa8] sm:$0xff] }
  0x25   : > { %v509_v11 = vld [vmem:[#allocation2 + $0x28] sm:$0xff]  ;;  %372 = vst.msk [vmem:[#allocation2 + $0xa8] sm:$0xff] %vm309_vm0, %v2066_v8  ;;  %373 = vst.msk [vmem:[#allocation2 + $0xb0] sm:$0xff] %vm309_vm0, %v2069_v9  ;;  %v510_v18 = vld [vmem:[#allocation2 + $0x30] sm:$0xff]  ;;  %v445_v21 = vmul.f32 %v2046_v1, %v408_v17 }
  0x26   : > { %v611_v12 = vld [vmem:[#allocation2 + $0x48] sm:$0xff]  ;;  %v546_v15 = vmul.f32 %v2051_v2, %v509_v11  ;;  %v612_v19 = vld [vmem:[#allocation2 + $0x50] sm:$0xff]  ;;  %v446_v20 = vmul.f32 %v2046_v1, %v509_v11  ;;  %v547_v26 = vmul.f32 %v2051_v2, %v510_v18  ;;  %v447_v28 = vmul.f32 %v2046_v1, %v510_v18  ;;  %374 = vst.msk [vmem:[#allocation2 + $0xc8] sm:$0xff] %vm309_vm0, %v2091_v22 }
  0x27   : > { %v548_v27 = vmul.f32 %v2051_v2, %v611_v12  ;;  %375 = vst.msk [vmem:[#allocation2 + $0xd0] sm:$0xff] %vm309_vm0, %v2094_v23  ;;  %376 = vst.msk [vmem:[#allocation2 + $0xe8] sm:$0xff] %vm309_vm0, %v2097_v24  ;;  %v477_v32 = vadd.f32 %v2057_v4, %v445_v21  ;;  %v448_v34 = vmul.f32 %v2046_v1, %v611_v12  ;;  %v2201_v8 = vld [vmem:[%s2041_s22 + $0xb0] sm:$0xff] }
  0x28   : > { %v478_v33 = vadd.f32 %v2057_v4, %v446_v20  ;;  %v449_v35 = vmul.f32 %v2046_v1, %v612_v19  ;;  %377 = vst.msk [vmem:[#allocation2 + $0xf0] sm:$0xff] %vm309_vm0, %v2110_v29  ;;  %378 = vst.msk [vmem:[#allocation2 + $0x108] sm:$0xff] %vm309_vm0, %v2113_v30  ;;  %v578_v39 = vadd.f32 %v546_v15, %v476_v25 }
  0x29   : > { %379 = vst.msk [vmem:[#allocation2 + $0x110] sm:$0xff] %vm309_vm0, %v2116_v31  ;;  %v648_v40 = vmul.f32 %v2074_v13, %v611_v12  ;;  %v479_v41 = vadd.f32 %v2057_v4, %v447_v28  ;;  %v549_v42 = vmul.f32 %v2051_v2, %v612_v19  ;;  %380 = vst.msk [vmem:[#allocation2 + $0x128] sm:$0xff] %vm309_vm0, %v2129_v36 }
  0x2a   : > { %381 = vst.msk [vmem:[#allocation2 + $0x130] sm:$0xff] %vm309_vm0, %v2132_v37  ;;  %382 = vst.msk [vmem:[#allocation2 + $0x148] sm:$0xff] %vm309_vm0, %v2135_v38  ;;  %v613_v48 = vld [vmem:[#allocation2 + $0x68] sm:$0xff]  ;;  %v614_v50 = vld [vmem:[#allocation2 + $0x70] sm:$0xff]  ;;  %v579_v52 = vadd.f32 %v547_v26, %v477_v32  ;;  %v649_v53 = vmul.f32 %v2074_v13, %v612_v19  ;;  %v480_v54 = vadd.f32 %v2057_v4, %v448_v34 }
  0x2b   : > { %383 = vst.msk [vmem:[#allocation2 + $0x150] sm:$0xff] %vm309_vm0, %v2147_v43  ;;  %384 = vst.msk [vmem:[#allocation2 + $0x168] sm:$0xff] %vm309_vm0, %v2150_v44  ;;  %v2171_v55 = vld [vmem:[#allocation2 + $0x88] sm:$0xff]  ;;  %v580_v57 = vadd.f32 %v548_v27, %v478_v33  ;;  %v550_v58 = vmul.f32 %v2051_v2, %v613_v48  ;;  %v481_v59 = vadd.f32 %v2057_v4, %v449_v35  ;;  %v2227_v19 = vld [vmem:[#allocation2 + $0x90] sm:$0xff] }
  0x2c   : > { %385 = vst.msk [vmem:[#allocation2 + $0x170] sm:$0xff] %vm309_vm0, %v2153_v45  ;;  %v551_v60 = vmul.f32 %v2051_v2, %v614_v50  ;;  %v680_v0 = vadd.f32 %v648_v40, %v578_v39  ;;  %v650_v3 = vmul.f32 %v2074_v13, %v613_v48  ;;  %v581_v5 = vadd.f32 %v549_v42, %v479_v41  ;;  %v2236_v25 = vld [vmem:[#allocation2 + $0xa8] sm:$0xff]  ;;  %v2241_v33 = vld [vmem:[#allocation2 + $0xb0] sm:$0xff]  ;;  %v2253_v42 = vld [vmem:[%s2041_s22 + $0xc0] sm:$0xff] }
  0x2d   : > { %v651_v6 = vmul.f32 %v2074_v13, %v614_v50  ;;  %386 = vst.msk [vmem:[#allocation2 + $0x188] sm:$0xff] %vm309_vm0, %v2181_v61  ;;  %387 = vst.msk [vmem:[#allocation2 + $0x190] sm:$0xff] %vm309_vm0, %v2184_v62  ;;  %v2208_v11 = vmul.f32 %v2086_v16, %v2069_v9  ;;  %v450_v12 = vmul.f32 %v2046_v1, %v613_v48  ;;  %v2245_v34 = vld [vmem:[#allocation2 + $0xc8] sm:$0xff]  ;;  %v2259_v48 = vld [vmem:[%s2041_s22 + $0xd0] sm:$0xff] }
  0x2e   : > { %388 = vst.msk [vmem:[#allocation2 + $0x1a8] sm:$0xff] %vm309_vm0, %v2187_v63  ;;  %v2217_v15 = vmul.f32 %v2086_v16, %v2094_v23  ;;  %389 = vst.msk [vmem:[#allocation2 + $0x1b0] sm:$0xff] %vm309_vm0, %v2198_v7  ;;  %v681_v9 = vadd.f32 %v649_v53, %v579_v52  ;;  %v582_v17 = vadd.f32 %v550_v58, %v480_v54  ;;  %v2281_v58 = vld [vmem:[%s2041_s22 + $0xe8] sm:$0xff] }
  0x2f   : > { %390 = vst.msk [vmem:[#allocation2 + $0x1c8] sm:$0xff] %vm309_vm0, %v2201_v8  ;;  %391 = vst.msk [vmem:[#allocation2 + $0x1d0] sm:$0xff] %vm309_vm0, %v2204_v10  ;;  %v652_v18 = vmul.f32 %v2074_v13, %v2171_v55  ;;  %v2231_v20 = vmul.f32 %v2086_v16, %v2097_v24  ;;  %v583_v21 = vadd.f32 %v551_v60, %v481_v59 }
  0x30   : > { %v482_v22 = vadd.f32 %v2057_v4, %v450_v12  ;;  %v552_v23 = vmul.f32 %v2051_v2, %v2171_v55  ;;  %v451_v26 = vmul.f32 %v2046_v1, %v614_v50  ;;  %v2239_v27 = vadd.f32 %v717_v46, %v680_v0  ;;  %v2256_v46 = vld [vmem:[%s2041_s22 + $0xc8] sm:$0xff]  ;;  %392 = vst.msk [vmem:[#allocation2 + $0x1e8] sm:$0xff] %vm309_vm0, %v2253_v42 }
  0x31   : > { %v682_v28 = vadd.f32 %v650_v3, %v580_v57  ;;  %v683_v32 = vadd.f32 %v651_v6, %v581_v5  ;;  %v452_v24 = vmul.f32 %v2046_v1, %v2171_v55  ;;  %v653_v35 = vmul.f32 %v2074_v13, %v2227_v19  ;;  %393 = vst.msk [vmem:[#allocation2 + $0x1f0] sm:$0xff] %vm309_vm0, %v2256_v46  ;;  %v2275_v57 = vld [vmem:[%s2041_s22 + $0xd8] sm:$0xff] }
  0x32   : > { %v584_v39 = vadd.f32 %v552_v23, %v482_v22  ;;  %v483_v40 = vadd.f32 %v2057_v4, %v451_v26  ;;  %v553_v41 = vmul.f32 %v2051_v2, %v2227_v19  ;;  %v2261_v50 = vadd.f32 %v718_v47, %v681_v9  ;;  %394 = vst.msk [vmem:[#allocation2 + $0x208] sm:$0xff] %vm309_vm0, %v2259_v48  ;;  %v2278_v47 = vld [vmem:[%s2041_s22 + $0xe0] sm:$0xff]  ;;  %v2294_v9 = vld [vmem:[#allocation2 + $0xd0] sm:$0xff] }
  0x33   : > { %v484_v52 = vadd.f32 %v2057_v4, %v452_v24  ;;  %v554_v53 = vmul.f32 %v2051_v2, %v2236_v25  ;;  %v453_v54 = vmul.f32 %v2046_v1, %v2227_v19  ;;  %v684_v59 = vadd.f32 %v652_v18, %v582_v17  ;;  %395 = vst.msk [vmem:[#allocation2 + $0x210] sm:$0xff] %vm309_vm0, %v2275_v57  ;;  %v2307_v26 = vld [vmem:[%s2041_s22 + $0xf0] sm:$0xff]  ;;  %v2310_v24 = vld [vmem:[%s2041_s22 + $0xf8] sm:$0xff] }
  0x34   : > { %v685_v60 = vadd.f32 %v653_v35, %v583_v21  ;;  %v654_v0 = vmul.f32 %v2074_v13, %v2236_v25  ;;  %v585_v3 = vadd.f32 %v553_v41, %v483_v40  ;;  %396 = vst.msk [vmem:[#allocation2 + $0x228] sm:$0xff] %vm309_vm0, %v2278_v47  ;;  %397 = vst.msk [vmem:[#allocation2 + $0x230] sm:$0xff] %vm309_vm0, %v2281_v58 }
  0x35   : > { %v655_v5 = vmul.f32 %v2074_v13, %v2241_v33  ;;  %v586_v6 = vadd.f32 %v554_v53, %v484_v52  ;;  %v485_v12 = vadd.f32 %v2057_v4, %v453_v54  ;;  %3223 = vst [vmem:[#allocation3_spill] sm:$0xff] %v2294_v9  ;;  %v454_v17 = vmul.f32 %v2046_v1, %v2236_v25  ;;  %v2315_v52 = vld [vmem:[#allocation2 + $0xe8] sm:$0xff] }
  0x36   : > { %v2299_v18 = vadd.f32 %v2158_v49, %v682_v28  ;;  %v2302_v21 = vadd.f32 %v2161_v51, %v683_v32  ;;  %v686_v22 = vadd.f32 %v654_v0, %v584_v39  ;;  %v656_v23 = vmul.f32 %v2074_v13, %v2245_v34  ;;  %3226 = vst [vmem:[#allocation6_spill] sm:$0xff] %v2315_v52 }
  0x37   : > { %v687_v35 = vadd.f32 %v655_v5, %v585_v3  ;;  %v555_v40 = vmul.f32 %v2051_v2, %v2241_v33  ;;  %v486_v41 = vadd.f32 %v2057_v4, %v454_v17  ;;  %v455_v49 = vmul.f32 %v2046_v1, %v2241_v33  ;;  %398 = vst.msk [vmem:[#allocation2 + $0x248] sm:$0xff] %vm309_vm0, %v2307_v26  ;;  %v2338_v5 = vld [vmem:[#allocation2 + $0xf0] sm:$0xff]  ;;  %v2356_v17 = vld [vmem:[#allocation2 + $0x108] sm:$0xff] }
  0x38   : > { %3224 = vst [vmem:[#allocation4_spill] sm:$0xff] %v2299_v18  ;;  %3225 = vst [vmem:[#allocation5_spill] sm:$0xff] %v2302_v21  ;;  %v2324_v51 = vadd.f32 %v2175_v56, %v684_v59  ;;  %v2327_v28 = vadd.f32 %v2208_v11, %v685_v60  ;;  %v657_v32 = vmul.f32 %v2074_v13, %v2294_v9 }
  0x39   : > { %399 = vst.msk [vmem:[#allocation2 + $0x250] sm:$0xff] %vm309_vm0, %v2310_v24  ;;  %v2333_v39 = vmul.f32 %v2086_v16, %v2110_v29  ;;  %v688_v53 = vadd.f32 %v656_v23, %v586_v6  ;;  %v587_v54 = vadd.f32 %v555_v40, %v485_v12  ;;  %v556_v0 = vmul.f32 %v2051_v2, %v2245_v34 }
  0x3a   : > { %3227 = vst [vmem:[#allocation7_spill] sm:$0xff] %v2324_v51  ;;  %3228 = vst [vmem:[#allocation8_spill] sm:$0xff] %v2327_v28  ;;  %v487_v3 = vadd.f32 %v2057_v4, %v455_v49  ;;  %v2341_v56 = vadd.f32 %v2213_v14, %v686_v22  ;;  %v658_v11 = vmul.f32 %v2074_v13, %v2315_v52 }
  0x3b   : > { %3229 = vst [vmem:[#allocation9_spill] sm:$0xff] %v2338_v5  ;;  %v557_v59 = vmul.f32 %v2051_v2, %v2294_v9  ;;  %v456_v29 = vmul.f32 %v2046_v1, %v2245_v34  ;;  %v2350_v60 = vadd.f32 %v2217_v15, %v687_v35  ;;  %v588_v6 = vadd.f32 %v556_v0, %v486_v41  ;;  %v2365_v35 = vld [vmem:[#allocation2 + $0x110] sm:$0xff] }
  0x3c   : > { %3230 = vst [vmem:[#allocation10_spill] sm:$0xff] %v2341_v56  ;;  %v2354_v12 = vmul.f32 %v2086_v16, %v2113_v30  ;;  %3232 = vst [vmem:[#allocation12_spill] sm:$0xff] %v2356_v17  ;;  %v457_v14 = vmul.f32 %v2046_v1, %v2294_v9  ;;  %v659_v23 = vmul.f32 %v2074_v13, %v2338_v5 }
  0x3d   : > { %3231 = vst [vmem:[#allocation11_spill] sm:$0xff] %v2350_v60  ;;  %v589_v22 = vadd.f32 %v557_v59, %v487_v3  ;;  %v488_v40 = vadd.f32 %v2057_v4, %v456_v29  ;;  %v558_v15 = vmul.f32 %v2051_v2, %v2315_v52  ;;  %3233 = vst [vmem:[#allocation13_spill] sm:$0xff] %v2365_v35 }
  0x3e   : > { %v2368_v41 = vadd.f32 %v2231_v20, %v688_v53  ;;  %v2370_v30 = vadd.f32 %v657_v32, %v587_v54  ;;  %v2374_v49 = vmul.f32 %v2086_v16, %v2116_v31  ;;  %v458_v0 = vmul.f32 %v2046_v1, %v2315_v52  ;;  %v2393_v54 = vld [vmem:[#allocation2 + $0x128] sm:$0xff] }
  0x3f   : > { %v590_v3 = vadd.f32 %v558_v15, %v488_v40  ;;  %v660_v59 = vmul.f32 %v2074_v13, %v2356_v17  ;;  %v2382_v29 = vmul.f32 %v2086_v16, %v2129_v36  ;;  %v489_v20 = vadd.f32 %v2057_v4, %v457_v14  ;;  %3235 = vst [vmem:[#allocation15_spill] sm:$0xff] %v2393_v54  ;;  %v2446_v52 = vld [vmem:[#allocation2 + $0x168] sm:$0xff] }
  0x40   : > { %3234 = vst [vmem:[#allocation14_spill] sm:$0xff] %v2368_v41  ;;  %v2385_v53 = vadd.f32 %v658_v11, %v588_v6  ;;  %v559_v32 = vmul.f32 %v2051_v2, %v2338_v5  ;;  %v2391_v31 = vmul.f32 %v2074_v13, %v2365_v35  ;;  %v459_v40 = vmul.f32 %v2046_v1, %v2338_v5  ;;  %v2404_v6 = vld [vmem:[#allocation2 + $0x130] sm:$0xff] }
  0x41   : > { %v2397_v15 = vadd.f32 %v659_v23, %v589_v22  ;;  %v2401_v36 = vmul.f32 %v2086_v16, %v2132_v37  ;;  %v490_v11 = vadd.f32 %v2057_v4, %v458_v0  ;;  %v732_v14 = vmul.f32 %v2086_v16, %v2147_v43  ;;  %v2415_v37 = vld [vmem:[#allocation2 + $0x148] sm:$0xff] }
  0x42   : > { %v560_v41 = vmul.f32 %v2051_v2, %v2356_v17  ;;  %v491_v60 = vadd.f32 %v2057_v4, %v459_v40  ;;  %v561_v22 = vmul.f32 %v2051_v2, %v2365_v35  ;;  %v460_v23 = vmul.f32 %v2046_v1, %v2356_v17  ;;  %3236 = vst [vmem:[#allocation16_spill] sm:$0xff] %v2415_v37 }
  0x43   : > { %v2417_v56 = vadd.f32 %v660_v59, %v590_v3  ;;  %v2419_v0 = vadd.f32 %v559_v32, %v489_v20  ;;  %v2423_v43 = vmul.f32 %v2074_v13, %v2393_v54  ;;  %v733_v28 = vmul.f32 %v2086_v16, %v2150_v44  ;;  %v2432_v3 = vld [vmem:[#allocation2 + $0x150] sm:$0xff] }
  0x44   : > { %v593_v40 = vadd.f32 %v561_v22, %v491_v60  ;;  %v663_v51 = vmul.f32 %v2074_v13, %v2404_v6  ;;  %v492_v5 = vadd.f32 %v2057_v4, %v460_v23  ;;  %v562_v17 = vmul.f32 %v2051_v2, %v2393_v54  ;;  %3237 = vst [vmem:[#allocation17_spill] sm:$0xff] %v2432_v3 }
  0x45   : > { %v2434_v59 = vadd.f32 %v560_v41, %v490_v11  ;;  %v664_v20 = vmul.f32 %v2074_v13, %v2415_v37  ;;  %v461_v32 = vmul.f32 %v2046_v1, %v2365_v35  ;;  %v734_v44 = vmul.f32 %v2086_v16, %v2153_v45 }
  0x46   : > { %v695_v60 = vadd.f32 %v663_v51, %v593_v40  ;;  %v594_v22 = vadd.f32 %v562_v17, %v492_v5  ;;  %v563_v23 = vmul.f32 %v2051_v2, %v2404_v6  ;;  %v462_v21 = vmul.f32 %v2046_v1, %v2393_v54  ;;  %v2460_v54 = vld [vmem:[#allocation2 + $0x170] sm:$0xff] }
  0x47   : > { %v493_v41 = vadd.f32 %v2057_v4, %v461_v32  ;;  %v665_v11 = vmul.f32 %v2074_v13, %v2432_v3  ;;  %v564_v35 = vmul.f32 %v2051_v2, %v2415_v37  ;;  %v735_v45 = vmul.f32 %v2086_v16, %v2181_v61 }
  0x48   : > { %v2455_v51 = vadd.f32 %v732_v14, %v695_v60  ;;  %v696_v5 = vadd.f32 %v664_v20, %v594_v22  ;;  %v494_v17 = vadd.f32 %v2057_v4, %v462_v21  ;;  %v463_v40 = vmul.f32 %v2046_v1, %v2404_v6  ;;  %v2473_v22 = vld [vmem:[#allocation2 + $0x188] sm:$0xff] }
  0x49   : > { %v595_v32 = vadd.f32 %v563_v23, %v493_v41  ;;  %v666_v18 = vmul.f32 %v2074_v13, %v2446_v52  ;;  %v565_v9 = vmul.f32 %v2051_v2, %v2432_v3  ;;  %v736_v61 = vmul.f32 %v2086_v16, %v2184_v62  ;;  %3240 = vst [vmem:[#allocation20_spill] sm:$0xff] %v2473_v22 }
  0x4a   : > { %3238 = vst [vmem:[#allocation18_spill] sm:$0xff] %v2455_v51  ;;  %v2468_v14 = vadd.f32 %v733_v28, %v696_v5  ;;  %v596_v20 = vadd.f32 %v564_v35, %v494_v17  ;;  %v495_v21 = vadd.f32 %v2057_v4, %v463_v40  ;;  %v464_v60 = vmul.f32 %v2046_v1, %v2415_v37  ;;  %v632_v40 = vld [vmem:[#allocation2 + $0x190] sm:$0xff] }
  0x4b   : > { %v697_v23 = vadd.f32 %v665_v11, %v595_v32  ;;  %v667_v41 = vmul.f32 %v2074_v13, %v2460_v54  ;;  %v566_v51 = vmul.f32 %v2051_v2, %v2446_v52  ;;  %v737_v62 = vmul.f32 %v2086_v16, %v2187_v63 }
  0x4c   : > { %3239 = vst [vmem:[#allocation19_spill] sm:$0xff] %v2468_v14  ;;  %v698_v28 = vadd.f32 %v666_v18, %v596_v20  ;;  %v597_v5 = vadd.f32 %v565_v9, %v495_v21  ;;  %v496_v35 = vadd.f32 %v2057_v4, %v464_v60  ;;  %v465_v17 = vmul.f32 %v2046_v1, %v2432_v3  ;;  %v633_v21 = vld [vmem:[#allocation2 + $0x1a8] sm:$0xff] }
  0x4d   : > { %v2484_v14 = vadd.f32 %v734_v44, %v697_v23  ;;  %v668_v11 = vmul.f32 %v2074_v13, %v2473_v22  ;;  %v567_v32 = vmul.f32 %v2051_v2, %v2460_v54  ;;  %v738_v37 = vmul.f32 %v2086_v16, %v2198_v7 }
  0x4e   : > { %v2492_v63 = vadd.f32 %v735_v45, %v698_v28  ;;  %v699_v9 = vadd.f32 %v667_v41, %v597_v5  ;;  %v598_v18 = vadd.f32 %v566_v51, %v496_v35  ;;  %v497_v20 = vadd.f32 %v2057_v4, %v465_v17  ;;  %v634_v41 = vld [vmem:[#allocation2 + $0x1b0] sm:$0xff] }
  0x4f   : > { %3241 = vst [vmem:[#allocation21_spill] sm:$0xff] %v2484_v14  ;;  %v669_v60 = vmul.f32 %v2074_v13, %v632_v40  ;;  %v466_v44 = vmul.f32 %v2046_v1, %v2446_v52  ;;  %v568_v23 = vmul.f32 %v2051_v2, %v2473_v22  ;;  %v739_v14 = vmul.f32 %v2086_v16, %v2201_v8 }
  0x50   : > { %3242 = vst [vmem:[#allocation22_spill] sm:$0xff] %v2492_v63  ;;  %v2502_v3 = vadd.f32 %v736_v61, %v699_v9  ;;  %v700_v7 = vadd.f32 %v668_v11, %v598_v18  ;;  %v599_v45 = vadd.f32 %v567_v32, %v497_v20  ;;  %v467_v51 = vmul.f32 %v2046_v1, %v2460_v54  ;;  %v635_v32 = vld [vmem:[#allocation2 + $0x1c8] sm:$0xff] }
  0x51   : > { %v498_v28 = vadd.f32 %v2057_v4, %v466_v44  ;;  %v670_v5 = vmul.f32 %v2074_v13, %v633_v21  ;;  %v569_v35 = vmul.f32 %v2051_v2, %v632_v40  ;;  %v740_v17 = vmul.f32 %v2086_v16, %v2204_v10 }
  0x52   : > { %3243 = vst [vmem:[#allocation23_spill] sm:$0xff] %v2502_v3  ;;  %v2511_v63 = vadd.f32 %v737_v62, %v700_v7  ;;  %v701_v8 = vadd.f32 %v669_v60, %v599_v45  ;;  %v499_v61 = vadd.f32 %v2057_v4, %v467_v51  ;;  %v468_v11 = vmul.f32 %v2046_v1, %v2473_v22  ;;  %v636_v7 = vld [vmem:[#allocation2 + $0x1d0] sm:$0xff] }
  0x53   : > { %v600_v9 = vadd.f32 %v568_v23, %v498_v28  ;;  %v671_v18 = vmul.f32 %v2074_v13, %v634_v41  ;;  %v570_v20 = vmul.f32 %v2051_v2, %v633_v21  ;;  %v741_v44 = vmul.f32 %v2086_v16, %v2253_v42 }
  0x54   : > { %3244 = vst [vmem:[#allocation24_spill] sm:$0xff] %v2511_v63  ;;  %v2520_v3 = vadd.f32 %v738_v37, %v701_v8  ;;  %v601_v10 = vadd.f32 %v569_v35, %v499_v61  ;;  %v500_v62 = vadd.f32 %v2057_v4, %v468_v11  ;;  %v469_v60 = vmul.f32 %v2046_v1, %v632_v40  ;;  %v637_v35 = vld [vmem:[#allocation2 + $0x1e8] sm:$0xff] }
  0x55   : > { %v702_v45 = vadd.f32 %v670_v5, %v600_v9  ;;  %v672_v51 = vmul.f32 %v2074_v13, %v635_v32  ;;  %v571_v23 = vmul.f32 %v2051_v2, %v634_v41  ;;  %v742_v28 = vmul.f32 %v2086_v16, %v2256_v46 }
  0x56   : > { %v703_v63 = vadd.f32 %v671_v18, %v601_v10  ;;  %v602_v22 = vadd.f32 %v570_v20, %v500_v62  ;;  %v501_v42 = vadd.f32 %v2057_v4, %v469_v60  ;;  %v470_v37 = vmul.f32 %v2046_v1, %v633_v21  ;;  %v638_v20 = vld [vmem:[#allocation2 + $0x1f0] sm:$0xff] }
  0x57   : > { %v2530_v8 = vadd.f32 %v739_v14, %v702_v45  ;;  %v673_v40 = vmul.f32 %v2074_v13, %v636_v7  ;;  %v572_v5 = vmul.f32 %v2051_v2, %v635_v32  ;;  %v743_v61 = vmul.f32 %v2086_v16, %v2259_v48 }
  0x58   : > { %v2536_v11 = vadd.f32 %v740_v17, %v703_v63  ;;  %v704_v9 = vadd.f32 %v672_v51, %v602_v22  ;;  %v603_v46 = vadd.f32 %v571_v23, %v501_v42  ;;  %v502_v18 = vadd.f32 %v2057_v4, %v470_v37  ;;  %v639_v22 = vld [vmem:[#allocation2 + $0x208] sm:$0xff] }
  0x59   : > { %v674_v10 = vmul.f32 %v2074_v13, %v637_v35  ;;  %v471_v21 = vmul.f32 %v2046_v1, %v634_v41  ;;  %v573_v14 = vmul.f32 %v2051_v2, %v636_v7  ;;  %v744_v62 = vmul.f32 %v2086_v16, %v2275_v57 }
  0x5a   : > { %v2544_v60 = vadd.f32 %v741_v44, %v704_v9  ;;  %v705_v45 = vadd.f32 %v673_v40, %v603_v46  ;;  %v604_v48 = vadd.f32 %v572_v5, %v502_v18  ;;  %v472_v63 = vmul.f32 %v2046_v1, %v635_v32  ;;  %v640_v40 = vld [vmem:[#allocation2 + $0x210] sm:$0xff]  ;;  %v641_v18 = vld [vmem:[#allocation2 + $0x228] sm:$0xff] }
  0x5b   : > { %v503_v17 = vadd.f32 %v2057_v4, %v471_v21  ;;  %v675_v51 = vmul.f32 %v2074_v13, %v638_v20  ;;  %v574_v23 = vmul.f32 %v2051_v2, %v637_v35  ;;  %v745_v41 = vmul.f32 %v2086_v16, %v2278_v47 }
  0x5c   : > { %v2552_v42 = vadd.f32 %v742_v28, %v705_v45  ;;  %v706_v37 = vadd.f32 %v674_v10, %v604_v48  ;;  %v504_v57 = vadd.f32 %v2057_v4, %v472_v63  ;;  %v473_v44 = vmul.f32 %v2046_v1, %v636_v7 }
  0x5d   : > { %v605_v5 = vadd.f32 %v573_v14, %v503_v17  ;;  %v676_v32 = vmul.f32 %v2074_v13, %v639_v22  ;;  %v575_v9 = vmul.f32 %v2051_v2, %v638_v20  ;;  %v746_v46 = vmul.f32 %v2086_v16, %v2281_v58 }
  0x5e   : > { %v2560_v21 = vadd.f32 %v743_v61, %v706_v37  ;;  %v606_v47 = vadd.f32 %v574_v23, %v504_v57  ;;  %v505_v28 = vadd.f32 %v2057_v4, %v473_v44  ;;  %v474_v10 = vmul.f32 %v2046_v1, %v637_v35  ;;  %v2573_v23 = vld [vmem:[%s3202_s0 + $0x4] ss:$0 sm:$0xff]  ;;  %v642_v35 = vld [vmem:[#allocation2 + $0x230] sm:$0xff] }
  0x5f   : > { %v707_v45 = vadd.f32 %v675_v51, %v605_v5  ;;  %v677_v7 = vmul.f32 %v2074_v13, %v640_v40  ;;  %v576_v14 = vmul.f32 %v2051_v2, %v639_v22  ;;  %v747_v48 = vmul.f32 %v2086_v16, %v2307_v26 }
  0x60   : > { %v708_v63 = vadd.f32 %v676_v32, %v606_v47  ;;  %v607_v17 = vadd.f32 %v575_v9, %v505_v28  ;;  %v506_v58 = vadd.f32 %v2057_v4, %v474_v10  ;;  %v678_v61 = vmul.f32 %v2074_v13, %v641_v18  ;;  %v2588_v9 = vld [vmem:[%s3202_s0 + $0x5] ss:$0 sm:$0xff]  ;;  %v2640_v18 = vld [vmem:[%s3203_s1 + $0x2] ss:$0 sm:$0xff]  ;;  %v1289_v47 = vld [vmem:[#allocation2 + $0x67] sm:$0xff] }
  0x61   : > { %v693_v51 = vadd.f32 %v2391_v31, %v2419_v0  ;;  %v2577_v37 = vadd.f32 %v744_v62, %v707_v45  ;;  %v475_v22 = vmul.f32 %v2046_v1, %v638_v20  ;;  %v577_v26 = vmul.f32 %v2051_v2, %v640_v40  ;;  %v1390_v28 = vld [vmem:[#allocation2 + $0x69] sm:$0xff] }
  0x62   : > { %v2581_v57 = vadd.f32 %v745_v41, %v708_v63  ;;  %v709_v44 = vadd.f32 %v677_v7, %v607_v17  ;;  %v608_v5 = vadd.f32 %v576_v14, %v506_v58  ;;  %v748_v32 = vmul.f32 %v2086_v16, %v2310_v24  ;;  %v1491_v63 = vld [vmem:[#allocation2 + $0x6a] sm:$0xff]  ;;  %v2659_v17 = vld [vmem:[%s3203_s1 + $0x4] ss:$0 sm:$0xff] }
  0x63   : > { %v2592_v31 = vadd.f32 %v2333_v39, %v2370_v30  ;;  %v507_v1 = vadd.f32 %v2057_v4, %v475_v22  ;;  %v679_v2 = vmul.f32 %v2074_v13, %v642_v35  ;;  %v819_v0 = vmul.f32 %v2573_v23, %v2171_v55  ;;  %v2607_v39 = vld [vmem:[%s3202_s0 + $0x6] ss:$0 sm:$0xff]  ;;  %v2612_v4 = vld [vmem:[%s3203_s1] ss:$0 sm:$0xff]  ;;  %v812_v55 = vld [vmem:[#allocation2 + $0x268] sm:$0xff] }
  0x64   : > { %v694_v20 = vadd.f32 %v2423_v43, %v2434_v59  ;;  %v731_v24 = vmul.f32 %v2086_v16, %v2135_v38  ;;  %v2602_v62 = vadd.f32 %v746_v46, %v709_v44  ;;  %v710_v41 = vadd.f32 %v678_v61, %v608_v5  ;;  %v813_v16 = vld [vmem:[#allocation2 + $0x270] sm:$0xff]  ;;  %v1087_v59 = vld [vmem:[#allocation2 + $0x65] sm:$0xff] }
  0x65   : > { %v2616_v13 = vadd.f32 %v2354_v12, %v2385_v53  ;;  %v609_v30 = vadd.f32 %v577_v26, %v507_v1  ;;  %v851_v38 = vadd.f32 %v819_v0, %v2239_v27  ;;  %v921_v43 = vmul.f32 %v2588_v9, %v2236_v25  ;;  %v2635_v27 = vld [vmem:[%s3203_s1 + $0x1] ss:$0 sm:$0xff]  ;;  %v1592_v35 = vld [vmem:[#allocation2 + $0x6b] sm:$0xff] }
  0x66   : > { %v2623_v40 = vadd.f32 %v2374_v49, %v2397_v15  ;;  %v2627_v46 = vadd.f32 %v2382_v29, %v2417_v56  ;;  %v2630_v12 = vadd.f32 %v2401_v36, %v693_v51  ;;  %v779_v53 = vadd.f32 %v747_v48, %v710_v41  ;;  %v2645_v49 = vld [vmem:[%s3203_s1 + $0x3] ss:$0 sm:$0xff]  ;;  %v1188_v36 = vld [vmem:[#allocation2 + $0x66] sm:$0xff] }
  0x67   : > { %v711_v56 = vadd.f32 %v679_v2, %v609_v30  ;;  %v953_v29 = vadd.f32 %v921_v43, %v851_v38  ;;  %v1023_v15 = vmul.f32 %v2607_v39, %v2245_v34  ;;  %v820_v10 = vmul.f32 %v2573_v23, %v2227_v19  ;;  %v2664_v19 = vld [vmem:[%s3203_s1 + $0x5] ss:$0 sm:$0xff]  ;;  %v1088_v1 = vld [vmem:[#allocation2 + $0x6d] sm:$0xff] }
  0x68   : > { %v2651_v45 = vadd.f32 %v731_v24, %v694_v20  ;;  %v849_v7 = vmul.f32 %v2573_v23, %v812_v55  ;;  %v850_v14 = vmul.f32 %v2573_v23, %v813_v16  ;;  %v1124_v48 = vmul.f32 %v2612_v4, %v1087_v59  ;;  %v3245_v41 = vld [vmem:[#allocation3_spill] sm:$0xff]  ;;  %v1290_v55 = vld [vmem:[#allocation2 + $0x6f] sm:$0xff] }
  0x69   : > { %v780_v58 = vadd.f32 %v748_v32, %v711_v56  ;;  %v1055_v61 = vadd.f32 %v1023_v15, %v953_v29  ;;  %v852_v51 = vadd.f32 %v820_v10, %v2261_v50  ;;  %v922_v22 = vmul.f32 %v2588_v9, %v2241_v33  ;;  %v1189_v32 = vld [vmem:[#allocation2 + $0x6e] sm:$0xff] }
  0x6a   : > { %v1225_v26 = vmul.f32 %v2635_v27, %v1188_v36  ;;  %v1326_v44 = vmul.f32 %v2640_v18, %v1289_v47  ;;  %v1427_v5 = vmul.f32 %v2645_v49, %v1390_v28  ;;  %v821_v2 = vmul.f32 %v2573_v23, %v2236_v25  ;;  %v1391_v38 = vld [vmem:[#allocation2 + $0x71] sm:$0xff]  ;;  %v3246_v59 = vld [vmem:[#allocation4_spill] sm:$0xff] }
  0x6b   : > { %v1156_v0 = vadd.f32 %v1124_v48, %v1055_v61  ;;  %v1528_v20 = vmul.f32 %v2659_v17, %v1491_v63  ;;  %v954_v24 = vadd.f32 %v922_v22, %v852_v51  ;;  %v1024_v50 = vmul.f32 %v2607_v39, %v3245_v41  ;;  %v1492_v43 = vld [vmem:[#allocation2 + $0x72] sm:$0xff]  ;;  %v1089_v28 = vld [vmem:[#allocation2 + $0x85] sm:$0xff] }
  0x6c   : > { %v2677_v30 = vadd.f32 %v849_v7, %v779_v53  ;;  %v1629_v16 = vmul.f32 %v2664_v19, %v1592_v35  ;;  %v853_v56 = vadd.f32 %v821_v2, %v3246_v59  ;;  %v923_v29 = vmul.f32 %v2588_v9, %v2245_v34  ;;  %v1593_v53 = vld [vmem:[#allocation2 + $0x73] sm:$0xff] }
  0x6d   : > { %v1257_v25 = vadd.f32 %v1225_v26, %v1156_v0  ;;  %v1056_v15 = vadd.f32 %v1024_v50, %v954_v24  ;;  %v1125_v36 = vmul.f32 %v2612_v4, %v1088_v1  ;;  %v1226_v47 = vmul.f32 %v2635_v27, %v1189_v32  ;;  %v3247_v48 = vld [vmem:[#allocation6_spill] sm:$0xff]  ;;  %v1190_v1 = vld [vmem:[#allocation2 + $0x86] sm:$0xff]  ;;  %v3248_v24 = vld [vmem:[#allocation5_spill] sm:$0xff] }
  0x6e   : > { %v1327_v10 = vmul.f32 %v2640_v18, %v1290_v55  ;;  %v955_v7 = vadd.f32 %v923_v29, %v853_v56  ;;  %v1025_v63 = vmul.f32 %v2607_v39, %v3247_v48  ;;  %v822_v61 = vmul.f32 %v2573_v23, %v2241_v33  ;;  %v1291_v0 = vld [vmem:[#allocation2 + $0x87] sm:$0xff] }
  0x6f   : > { %v1358_v35 = vadd.f32 %v1326_v44, %v1257_v25  ;;  %v1157_v51 = vadd.f32 %v1125_v36, %v1056_v15  ;;  %v1428_v22 = vmul.f32 %v2645_v49, %v1391_v38  ;;  %v1529_v26 = vmul.f32 %v2659_v17, %v1492_v43  ;;  %v1392_v38 = vld [vmem:[#allocation2 + $0x89] sm:$0xff] }
  0x70   : > { %v1057_v2 = vadd.f32 %v1025_v63, %v955_v7  ;;  %v1126_v32 = vmul.f32 %v2612_v4, %v1089_v28  ;;  %v854_v50 = vadd.f32 %v822_v61, %v3248_v24  ;;  %v924_v55 = vmul.f32 %v2588_v9, %v3245_v41  ;;  %v1090_v29 = vld [vmem:[#allocation2 + $0x8d] sm:$0xff] }
  0x71   : > { %v2696_v59 = vadd.f32 %v850_v14, %v780_v58  ;;  %v1459_v33 = vadd.f32 %v1427_v5, %v1358_v35  ;;  %v1258_v44 = vadd.f32 %v1226_v47, %v1157_v51  ;;  %v1630_v56 = vmul.f32 %v2664_v19, %v1593_v53  ;;  %v3249_v36 = vld [vmem:[#allocation9_spill] sm:$0xff] }
  0x72   : > { %v1158_v43 = vadd.f32 %v1126_v32, %v1057_v2  ;;  %v1227_v25 = vmul.f32 %v2635_v27, %v1190_v1  ;;  %v956_v15 = vadd.f32 %v924_v55, %v854_v50  ;;  %v1026_v28 = vmul.f32 %v2607_v39, %v3249_v36  ;;  %v1493_v14 = vld [vmem:[#allocation2 + $0x8a] sm:$0xff]  ;;  %v3250_v32 = vld [vmem:[#allocation7_spill] sm:$0xff] }
  0x73   : > { %v1560_v7 = vadd.f32 %v1528_v20, %v1459_v33  ;;  %v1359_v63 = vadd.f32 %v1327_v10, %v1258_v44  ;;  %v1328_v61 = vmul.f32 %v2640_v18, %v1291_v0  ;;  %v1191_v58 = vld [vmem:[#allocation2 + $0x8e] sm:$0xff]  ;;  %v823_v5 = vmul.f32 %v2573_v23, %v2245_v34 }
  0x74   : > { %v1259_v47 = vadd.f32 %v1227_v25, %v1158_v43  ;;  %v1429_v53 = vmul.f32 %v2645_v49, %v1392_v38  ;;  %v1594_v35 = vld [vmem:[#allocation2 + $0x8b] sm:$0xff]  ;;  %v1058_v20 = vadd.f32 %v1026_v28, %v956_v15  ;;  %v1127_v10 = vmul.f32 %v2612_v4, %v1090_v29 }
  0x75   : > { %v1661_v51 = vadd.f32 %v1629_v16, %v1560_v7  ;;  %v1460_v1 = vadd.f32 %v1428_v22, %v1359_v63  ;;  %v1292_v2 = vld [vmem:[#allocation2 + $0x8f] sm:$0xff]  ;;  %v855_v0 = vadd.f32 %v823_v5, %v3250_v32  ;;  %v925_v34 = vmul.f32 %v2588_v9, %v3247_v48  ;;  %v1091_v38 = vld [vmem:[#allocation2 + $0xa5] sm:$0xff] }
  0x76   : > { %v1360_v24 = vadd.f32 %v1328_v61, %v1259_v47  ;;  %v1530_v50 = vmul.f32 %v2659_v17, %v1493_v14  ;;  %v1159_v55 = vadd.f32 %v1127_v10, %v1058_v20  ;;  %v1228_v33 = vmul.f32 %v2635_v27, %v1191_v58  ;;  %v1393_v44 = vld [vmem:[#allocation2 + $0x91] sm:$0xff]  ;;  %v3251_v29 = vld [vmem:[#allocation12_spill] sm:$0xff] }
  0x77   : > { %1693 = vst.msk [vmem:[%s2710_s6] sm:$0xff] %vm309_vm0, %v1661_v51  ;;  %v1561_v43 = vadd.f32 %v1529_v26, %v1460_v1  ;;  %v1631_v16 = vmul.f32 %v2664_v19, %v1594_v35  ;;  %v957_v22 = vadd.f32 %v925_v34, %v855_v0  ;;  %v1027_v25 = vmul.f32 %v2607_v39, %v3251_v29  ;;  %v1494_v63 = vld [vmem:[#allocation2 + $0x92] sm:$0xff]  ;;  %v1192_v14 = vld [vmem:[#allocation2 + $0xa6] sm:$0xff] }
  0x78   : > { %v1461_v15 = vadd.f32 %v1429_v53, %v1360_v24  ;;  %v1260_v28 = vadd.f32 %v1228_v33, %v1159_v55  ;;  %v1329_v7 = vmul.f32 %v2640_v18, %v1292_v2  ;;  %v1595_v61 = vld [vmem:[#allocation2 + $0x93] sm:$0xff]  ;;  %v824_v58 = vmul.f32 %v2573_v23, %v3245_v41  ;;  %v1293_v51 = vld [vmem:[#allocation2 + $0xa7] sm:$0xff] }
  0x79   : > { %v1662_v5 = vadd.f32 %v1630_v56, %v1561_v43  ;;  %v1430_v26 = vmul.f32 %v2645_v49, %v1393_v44  ;;  %v1059_v47 = vadd.f32 %v1027_v25, %v957_v22  ;;  %v1128_v35 = vmul.f32 %v2612_v4, %v1091_v38  ;;  %v1394_v53 = vld [vmem:[#allocation2 + $0xa9] sm:$0xff] }
  0x7a   : > { %v1562_v20 = vadd.f32 %v1530_v50, %v1461_v15  ;;  %v1361_v10 = vadd.f32 %v1329_v7, %v1260_v28  ;;  %v3252_v1 = vld [vmem:[#allocation8_spill] sm:$0xff]  ;;  %v926_v2 = vmul.f32 %v2588_v9, %v3249_v36  ;;  %v1531_v0 = vmul.f32 %v2659_v17, %v1494_v63  ;;  %v3253_v43 = vld [vmem:[#allocation13_spill] sm:$0xff] }
  0x7b   : > { %v856_v32 = vadd.f32 %v824_v58, %v3252_v1  ;;  %1694 = vst.msk [vmem:[%s2710_s6 + $0x8] sm:$0xff] %vm309_vm0, %v1662_v5  ;;  %v1632_v41 = vmul.f32 %v2664_v19, %v1595_v61  ;;  %v1160_v56 = vadd.f32 %v1128_v35, %v1059_v47  ;;  %v1229_v34 = vmul.f32 %v2635_v27, %v1192_v14  ;;  %v1495_v24 = vld [vmem:[#allocation2 + $0xaa] sm:$0xff] }
  0x7c   : > { %v1092_v50 = vld [vmem:[#allocation2 + $0xad] sm:$0xff]  ;;  %v1663_v55 = vadd.f32 %v1631_v16, %v1562_v20  ;;  %v1462_v33 = vadd.f32 %v1430_v26, %v1361_v10  ;;  %v1028_v22 = vmul.f32 %v2607_v39, %v3253_v43  ;;  %v1330_v15 = vmul.f32 %v2640_v18, %v1293_v51  ;;  %v3254_v10 = vld [vmem:[#allocation10_spill] sm:$0xff] }
  0x7d   : > { %v1596_v44 = vld [vmem:[#allocation2 + $0xab] sm:$0xff]  ;;  %v958_v38 = vadd.f32 %v926_v2, %v856_v32  ;;  %v1261_v25 = vadd.f32 %v1229_v34, %v1160_v56  ;;  %v1431_v28 = vmul.f32 %v2645_v49, %v1394_v53  ;;  %v825_v61 = vmul.f32 %v2573_v23, %v3247_v48  ;;  %v1597_v34 = vld [vmem:[#allocation2 + $0xb3] sm:$0xff] }
  0x7e   : > { %v1193_v7 = vld [vmem:[#allocation2 + $0xae] sm:$0xff]  ;;  %1695 = vst.msk [vmem:[%s2710_s6 + $0x10] sm:$0xff] %vm309_vm0, %v1663_v55  ;;  %v1563_v14 = vadd.f32 %v1531_v0, %v1462_v33  ;;  %v1532_v16 = vmul.f32 %v2659_v17, %v1495_v24  ;;  %v1129_v5 = vmul.f32 %v2612_v4, %v1092_v50  ;;  %v1633_v47 = vmul.f32 %v2664_v19, %v1596_v44  ;;  %v1093_v48 = vld [vmem:[#allocation2 + $0xc5] sm:$0xff] }
  0x7f   : > { %v1294_v63 = vld [vmem:[#allocation2 + $0xaf] sm:$0xff]  ;;  %v1060_v58 = vadd.f32 %v1028_v22, %v958_v38  ;;  %v1362_v26 = vadd.f32 %v1330_v15, %v1261_v25  ;;  %v857_v51 = vadd.f32 %v825_v61, %v3254_v10  ;;  %v927_v53 = vmul.f32 %v2588_v9, %v3251_v29  ;;  %v3255_v50 = vld [vmem:[#allocation15_spill] sm:$0xff] }
  0x80   : > { %v1395_v35 = vld [vmem:[#allocation2 + $0xb1] sm:$0xff]  ;;  %v1664_v1 = vadd.f32 %v1632_v41, %v1563_v14  ;;  %v1230_v2 = vmul.f32 %v2635_v27, %v1193_v7  ;;  %v1331_v0 = vmul.f32 %v2640_v18, %v1294_v63  ;;  %v1029_v55 = vmul.f32 %v2607_v39, %v3255_v50  ;;  %v1194_v33 = vld [vmem:[#allocation2 + $0xc6] sm:$0xff] }
  0x81   : > { %v1496_v20 = vld [vmem:[#allocation2 + $0xb2] sm:$0xff]  ;;  %v1161_v32 = vadd.f32 %v1129_v5, %v1060_v58  ;;  %v1463_v56 = vadd.f32 %v1431_v28, %v1362_v26  ;;  %v959_v24 = vadd.f32 %v927_v53, %v857_v51  ;;  %v826_v44 = vmul.f32 %v2573_v23, %v3249_v36  ;;  %v1295_v7 = vld [vmem:[#allocation2 + $0xc7] sm:$0xff] }
  0x82   : > { %1696 = vst.msk [vmem:[%s2710_s6 + $0x18] sm:$0xff] %vm309_vm0, %v1664_v1  ;;  %v1432_v41 = vmul.f32 %v2645_v49, %v1395_v35  ;;  %v1533_v22 = vmul.f32 %v2659_v17, %v1496_v20  ;;  %v1130_v25 = vmul.f32 %v2612_v4, %v1093_v48  ;;  %v1396_v63 = vld [vmem:[#allocation2 + $0xc9] sm:$0xff]  ;;  %v3256_v61 = vld [vmem:[#allocation11_spill] sm:$0xff]  ;;  %v928_v58 = vmul.f32 %v2588_v9, %v3253_v43 }
  0x83   : > { %v1262_v38 = vadd.f32 %v1230_v2, %v1161_v32  ;;  %v1564_v15 = vadd.f32 %v1532_v16, %v1463_v56  ;;  %v1061_v28 = vadd.f32 %v1029_v55, %v959_v24  ;;  %v858_v14 = vadd.f32 %v826_v44, %v3256_v61  ;;  %v1094_v5 = vld [vmem:[#allocation2 + $0xcd] sm:$0xff]  ;;  %v3257_v44 = vld [vmem:[#allocation14_spill] sm:$0xff] }
  0x84   : > { %v1634_v26 = vmul.f32 %v2664_v19, %v1597_v34  ;;  %v1231_v35 = vmul.f32 %v2635_v27, %v1194_v33  ;;  %v1030_v20 = vmul.f32 %v2607_v39, %v2404_v6  ;;  %v1497_v51 = vld [vmem:[#allocation2 + $0xca] sm:$0xff]  ;;  %v827_v32 = vmul.f32 %v2573_v23, %v3251_v29 }
  0x85   : > { %v1363_v36 = vadd.f32 %v1331_v0, %v1262_v38  ;;  %v1665_v10 = vadd.f32 %v1633_v47, %v1564_v15  ;;  %v1162_v16 = vadd.f32 %v1130_v25, %v1061_v28  ;;  %v1598_v53 = vld [vmem:[#allocation2 + $0xcb] sm:$0xff]  ;;  %v960_v48 = vadd.f32 %v928_v58, %v858_v14  ;;  %v1599_v58 = vld [vmem:[#allocation2 + $0xd3] sm:$0xff] }
  0x86   : > { %v1195_v1 = vld [vmem:[#allocation2 + $0xce] sm:$0xff]  ;;  %v1332_v56 = vmul.f32 %v2640_v18, %v1295_v7  ;;  %v1433_v0 = vmul.f32 %v2645_v49, %v1396_v63  ;;  %v1131_v34 = vmul.f32 %v2612_v4, %v1094_v5  ;;  %v859_v38 = vadd.f32 %v827_v32, %v3257_v44  ;;  %v1095_v7 = vld [vmem:[#allocation2 + $0xe5] sm:$0xff] }
  0x87   : > { %v1464_v2 = vadd.f32 %v1432_v41, %v1363_v36  ;;  %1697 = vst.msk [vmem:[%s2710_s6 + $0x20] sm:$0xff] %vm309_vm0, %v1665_v10  ;;  %v1263_v24 = vadd.f32 %v1231_v35, %v1162_v16  ;;  %v1062_v55 = vadd.f32 %v1030_v20, %v960_v48  ;;  %v1296_v47 = vld [vmem:[#allocation2 + $0xcf] sm:$0xff]  ;;  %v929_v25 = vmul.f32 %v2588_v9, %v3255_v50  ;;  %v1196_v10 = vld [vmem:[#allocation2 + $0xe6] sm:$0xff] }
  0x88   : > { %v1397_v33 = vld [vmem:[#allocation2 + $0xd1] sm:$0xff]  ;;  %v1534_v29 = vmul.f32 %v2659_v17, %v1497_v51  ;;  %v1635_v41 = vmul.f32 %v2664_v19, %v1598_v53  ;;  %v1232_v28 = vmul.f32 %v2635_v27, %v1195_v1  ;;  %v3258_v36 = vld [vmem:[#allocation16_spill] sm:$0xff]  ;;  %v1333_v50 = vmul.f32 %v2640_v18, %v1296_v47 }
  0x89   : > { %v1565_v15 = vadd.f32 %v1533_v22, %v1464_v2  ;;  %v1364_v63 = vadd.f32 %v1332_v56, %v1263_v24  ;;  %v1163_v61 = vadd.f32 %v1131_v34, %v1062_v55  ;;  %v1498_v14 = vld [vmem:[#allocation2 + $0xd2] sm:$0xff]  ;;  %v961_v5 = vadd.f32 %v929_v25, %v859_v38  ;;  %v1297_v32 = vld [vmem:[#allocation2 + $0xe7] sm:$0xff] }
  0x8a   : > { %v1031_v35 = vmul.f32 %v2607_v39, %v3258_v36  ;;  %v1434_v22 = vmul.f32 %v2645_v49, %v1397_v33  ;;  %v828_v16 = vmul.f32 %v2573_v23, %v3253_v43  ;;  %v1132_v1 = vmul.f32 %v2612_v4, %v1095_v7  ;;  %v792_v2 = vld [vmem:[#allocation2 + $0x128] sm:$0xff]  ;;  %v3259_v7 = vld [vmem:[#allocation17_spill] sm:$0xff] }
  0x8b   : > { %v1666_v20 = vadd.f32 %v1634_v26, %v1565_v15  ;;  %v1465_v51 = vadd.f32 %v1433_v0, %v1364_v63  ;;  %v1264_v53 = vadd.f32 %v1232_v28, %v1163_v61  ;;  %v1535_v56 = vmul.f32 %v2659_v17, %v1498_v14  ;;  %v1398_v34 = vld [vmem:[#allocation2 + $0xe9] sm:$0xff] }
  0x8c   : > { %v1063_v48 = vadd.f32 %v1031_v35, %v961_v5  ;;  %v1636_v26 = vmul.f32 %v2664_v19, %v1599_v58  ;;  %v860_v24 = vadd.f32 %v828_v16, %v2592_v31  ;;  %v930_v55 = vmul.f32 %v2588_v9, %v2404_v6  ;;  %v1096_v44 = vld [vmem:[#allocation2 + $0xed] sm:$0xff] }
  0x8d   : > { %1698 = vst.msk [vmem:[%s2710_s6 + $0x28] sm:$0xff] %vm309_vm0, %v1666_v20  ;;  %v1566_v43 = vadd.f32 %v1534_v29, %v1465_v51  ;;  %v1365_v0 = vadd.f32 %v1333_v50, %v1264_v53  ;;  %v1233_v33 = vmul.f32 %v2635_v27, %v1196_v10  ;;  %v1334_v38 = vmul.f32 %v2640_v18, %v1297_v32  ;;  %v1499_v25 = vld [vmem:[#allocation2 + $0xea] sm:$0xff] }
  0x8e   : > { %v1164_v47 = vadd.f32 %v1132_v1, %v1063_v48  ;;  %v1600_v15 = vld [vmem:[#allocation2 + $0xeb] sm:$0xff]  ;;  %v962_v28 = vadd.f32 %v930_v55, %v860_v24  ;;  %v1032_v63 = vmul.f32 %v2607_v39, %v3259_v7  ;;  %v829_v31 = vmul.f32 %v2573_v23, %v792_v2 }
  0x8f   : > { %v1667_v61 = vadd.f32 %v1635_v41, %v1566_v43  ;;  %v1466_v14 = vadd.f32 %v1434_v22, %v1365_v0  ;;  %v1435_v29 = vmul.f32 %v2645_v49, %v1398_v34  ;;  %v1197_v58 = vld [vmem:[#allocation2 + $0xee] sm:$0xff]  ;;  %v1133_v35 = vmul.f32 %v2612_v4, %v1096_v44  ;;  %v1097_v1 = vld [vmem:[#allocation2 + $0x105] sm:$0xff] }
  0x90   : > { %v1265_v6 = vadd.f32 %v1233_v33, %v1164_v47  ;;  %v1064_v5 = vadd.f32 %v1032_v63, %v962_v28  ;;  %v1298_v20 = vld [vmem:[#allocation2 + $0xef] sm:$0xff]  ;;  %v861_v50 = vadd.f32 %v829_v31, %v2616_v13  ;;  %v931_v10 = vmul.f32 %v2588_v9, %v3258_v36  ;;  %v1198_v47 = vld [vmem:[#allocation2 + $0x106] sm:$0xff] }
  0x91   : > { %v793_v16 = vld [vmem:[#allocation2 + $0x130] sm:$0xff]  ;;  %1699 = vst.msk [vmem:[%s2710_s6 + $0x30] sm:$0xff] %vm309_vm0, %v1667_v61  ;;  %v1567_v51 = vadd.f32 %v1535_v56, %v1466_v14  ;;  %v1536_v41 = vmul.f32 %v2659_v17, %v1499_v25  ;;  %v1637_v22 = vmul.f32 %v2664_v19, %v1600_v15  ;;  %v1234_v2 = vmul.f32 %v2635_v27, %v1197_v58  ;;  %v794_v28 = vld [vmem:[#allocation2 + $0x148] sm:$0xff] }
  0x92   : > { %v1366_v53 = vadd.f32 %v1334_v38, %v1265_v6  ;;  %v1399_v48 = vld [vmem:[#allocation2 + $0xf1] sm:$0xff]  ;;  %v1165_v32 = vadd.f32 %v1133_v35, %v1064_v5  ;;  %v963_v13 = vadd.f32 %v931_v10, %v861_v50  ;;  %v1033_v36 = vmul.f32 %v2607_v39, %v2446_v52  ;;  %v1400_v63 = vld [vmem:[#allocation2 + $0x109] sm:$0xff] }
  0x93   : > { %v1500_v34 = vld [vmem:[#allocation2 + $0xf2] sm:$0xff]  ;;  %v1668_v55 = vadd.f32 %v1636_v26, %v1567_v51  ;;  %v1335_v56 = vmul.f32 %v2640_v18, %v1298_v20  ;;  %v830_v33 = vmul.f32 %v2573_v23, %v793_v16  ;;  %v1436_v38 = vmul.f32 %v2645_v49, %v1399_v48  ;;  %v1299_v26 = vld [vmem:[#allocation2 + $0x107] sm:$0xff] }
  0x94   : > { %v895_v24 = vld [vmem:[#allocation2 + $0x150] sm:$0xff]  ;;  %v1467_v43 = vadd.f32 %v1435_v29, %v1366_v53  ;;  %v1266_v44 = vadd.f32 %v1234_v2, %v1165_v32  ;;  %v1065_v25 = vadd.f32 %v1033_v36, %v963_v13  ;;  %v1134_v15 = vmul.f32 %v2612_v4, %v1097_v1  ;;  %v896_v35 = vld [vmem:[#allocation2 + $0x168] sm:$0xff] }
  0x95   : > { %v1601_v0 = vld [vmem:[#allocation2 + $0xf3] sm:$0xff]  ;;  %1700 = vst.msk [vmem:[%s2710_s6 + $0x38] sm:$0xff] %vm309_vm0, %v1668_v55  ;;  %v1537_v52 = vmul.f32 %v2659_v17, %v1500_v34  ;;  %v862_v31 = vadd.f32 %v830_v33, %v2623_v40  ;;  %v932_v61 = vmul.f32 %v2588_v9, %v895_v24  ;;  %v1235_v58 = vmul.f32 %v2635_v27, %v1198_v47  ;;  %v1501_v50 = vld [vmem:[#allocation2 + $0x10a] sm:$0xff] }
  0x96   : > { %v1568_v7 = vadd.f32 %v1536_v41, %v1467_v43  ;;  %v1367_v14 = vadd.f32 %v1335_v56, %v1266_v44  ;;  %v1638_v6 = vmul.f32 %v2664_v19, %v1601_v0  ;;  %v1166_v29 = vadd.f32 %v1134_v15, %v1065_v25  ;;  %v1098_v5 = vld [vmem:[#allocation2 + $0x10d] sm:$0xff]  ;;  %v1099_v47 = vld [vmem:[#allocation2 + $0x125] sm:$0xff] }
  0x97   : > { %v1602_v10 = vld [vmem:[#allocation2 + $0x10b] sm:$0xff]  ;;  %v964_v16 = vadd.f32 %v932_v61, %v862_v31  ;;  %v1034_v51 = vmul.f32 %v2607_v39, %v2460_v54  ;;  %v831_v40 = vmul.f32 %v2573_v23, %v794_v28  ;;  %v1336_v48 = vmul.f32 %v2640_v18, %v1299_v26 }
  0x98   : > { %v1669_v20 = vadd.f32 %v1637_v22, %v1568_v7  ;;  %v1468_v53 = vadd.f32 %v1436_v38, %v1367_v14  ;;  %v1267_v41 = vadd.f32 %v1235_v58, %v1166_v29  ;;  %v1437_v1 = vmul.f32 %v2645_v49, %v1400_v63  ;;  %v1199_v32 = vld [vmem:[#allocation2 + $0x10e] sm:$0xff]  ;;  %v1200_v31 = vld [vmem:[#allocation2 + $0x126] sm:$0xff] }
  0x99   : > { %v1066_v2 = vadd.f32 %v1034_v51, %v964_v16  ;;  %v1135_v22 = vmul.f32 %v2612_v4, %v1098_v5  ;;  %v1300_v34 = vld [vmem:[#allocation2 + $0x10f] sm:$0xff]  ;;  %v863_v13 = vadd.f32 %v831_v40, %v2627_v46  ;;  %v933_v36 = vmul.f32 %v2588_v9, %v896_v35 }
  0x9a   : > { %1701 = vst.msk [vmem:[%s2710_s6 + $0x40] sm:$0xff] %vm309_vm0, %v1669_v20  ;;  %v1569_v54 = vadd.f32 %v1537_v52, %v1468_v53  ;;  %v1368_v55 = vadd.f32 %v1336_v48, %v1267_v41  ;;  %v1538_v43 = vmul.f32 %v2659_v17, %v1501_v50  ;;  %v1639_v56 = vmul.f32 %v2664_v19, %v1602_v10  ;;  %v1401_v0 = vld [vmem:[#allocation2 + $0x111] sm:$0xff]  ;;  %v3260_v15 = vld [vmem:[#allocation20_spill] sm:$0xff] }
  0x9b   : > { %v1167_v33 = vadd.f32 %v1135_v22, %v1066_v2  ;;  %v1236_v44 = vmul.f32 %v2635_v27, %v1199_v32  ;;  %v1502_v38 = vld [vmem:[#allocation2 + $0x112] sm:$0xff]  ;;  %v965_v25 = vadd.f32 %v933_v36, %v863_v13  ;;  %v1035_v28 = vmul.f32 %v2607_v39, %v3260_v15  ;;  %v1301_v10 = vld [vmem:[#allocation2 + $0x127] sm:$0xff] }
  0x9c   : > { %v897_v46 = vld [vmem:[#allocation2 + $0x170] sm:$0xff]  ;;  %v1670_v7 = vadd.f32 %v1638_v6, %v1569_v54  ;;  %v1469_v26 = vadd.f32 %v1437_v1, %v1368_v55  ;;  %v1337_v52 = vmul.f32 %v2640_v18, %v1300_v34  ;;  %v832_v61 = vmul.f32 %v2573_v23, %v895_v24  ;;  %v898_v32 = vld [vmem:[#allocation2 + $0x188] sm:$0xff] }
  0x9d   : > { %v1603_v63 = vld [vmem:[#allocation2 + $0x113] sm:$0xff]  ;;  %v1268_v14 = vadd.f32 %v1236_v44, %v1167_v33  ;;  %v1438_v29 = vmul.f32 %v2645_v49, %v1401_v0  ;;  %v1067_v58 = vadd.f32 %v1035_v28, %v965_v25  ;;  %v1136_v5 = vmul.f32 %v2612_v4, %v1099_v47  ;;  %v1402_v16 = vld [vmem:[#allocation2 + $0x129] sm:$0xff] }
  0x9e   : > { %v2843_v20 = vld [vmem:[#allocation2 + $0x190] sm:$0xff]  ;;  %1702 = vst.msk [vmem:[%s2710_s6 + $0x48] sm:$0xff] %vm309_vm0, %v1670_v7  ;;  %v1570_v50 = vadd.f32 %v1538_v43, %v1469_v26  ;;  %v1539_v6 = vmul.f32 %v2659_v17, %v1502_v38  ;;  %v864_v51 = vadd.f32 %v832_v61, %v2630_v12  ;;  %v934_v40 = vmul.f32 %v2588_v9, %v897_v46  ;;  %v2857_v33 = vld [vmem:[#allocation2 + $0x1a8] sm:$0xff] }
  0x9f   : > { %v1369_v24 = vadd.f32 %v1337_v52, %v1268_v14  ;;  %v1640_v53 = vmul.f32 %v2664_v19, %v1603_v63  ;;  %v1168_v41 = vadd.f32 %v1136_v5, %v1067_v58  ;;  %v1237_v48 = vmul.f32 %v2635_v27, %v1200_v31  ;;  %v1100_v1 = vld [vmem:[#allocation2 + $0x12d] sm:$0xff]  ;;  %v1101_v63 = vld [vmem:[#allocation2 + $0x145] sm:$0xff] }
  0xa0   : > { %v1671_v2 = vadd.f32 %v1639_v56, %v1570_v50  ;;  %v1503_v22 = vld [vmem:[#allocation2 + $0x12a] sm:$0xff]  ;;  %v966_v13 = vadd.f32 %v934_v40, %v864_v51  ;;  %v1036_v36 = vmul.f32 %v2607_v39, %v2843_v20  ;;  %v833_v12 = vmul.f32 %v2573_v23, %v896_v35  ;;  %v1504_v14 = vld [vmem:[#allocation2 + $0x132] sm:$0xff] }
  0xa1   : > { %v1604_v34 = vld [vmem:[#allocation2 + $0x12b] sm:$0xff]  ;;  %v1470_v54 = vadd.f32 %v1438_v29, %v1369_v24  ;;  %v1269_v55 = vadd.f32 %v1237_v48, %v1168_v41  ;;  %v1338_v43 = vmul.f32 %v2640_v18, %v1301_v10  ;;  %v1439_v0 = vmul.f32 %v2645_v49, %v1402_v16 }
  0xa2   : > { %v1201_v47 = vld [vmem:[#allocation2 + $0x12e] sm:$0xff]  ;;  %1703 = vst.msk [vmem:[%s2710_s6 + $0x50] sm:$0xff] %vm309_vm0, %v1671_v2  ;;  %v1068_v56 = vadd.f32 %v1036_v36, %v966_v13  ;;  %v1137_v44 = vmul.f32 %v2612_v4, %v1100_v1  ;;  %v865_v25 = vadd.f32 %v833_v12, %v2651_v45  ;;  %v935_v15 = vmul.f32 %v2588_v9, %v898_v32  ;;  %v1202_v10 = vld [vmem:[#allocation2 + $0x146] sm:$0xff] }
  0xa3   : > { %v1302_v38 = vld [vmem:[#allocation2 + $0x12f] sm:$0xff]  ;;  %v1571_v35 = vadd.f32 %v1539_v6, %v1470_v54  ;;  %v1370_v28 = vadd.f32 %v1338_v43, %v1269_v55  ;;  %v1540_v7 = vmul.f32 %v2659_v17, %v1503_v22  ;;  %v1641_v26 = vmul.f32 %v2664_v19, %v1604_v34  ;;  %v1303_v2 = vld [vmem:[#allocation2 + $0x147] sm:$0xff]  ;;  %v3261_v34 = vld [vmem:[#allocation18_spill] sm:$0xff] }
  0xa4   : > { %v1403_v52 = vld [vmem:[#allocation2 + $0x131] sm:$0xff]  ;;  %v1169_v31 = vadd.f32 %v1137_v44, %v1068_v56  ;;  %v1238_v61 = vmul.f32 %v2635_v27, %v1201_v47  ;;  %v967_v29 = vadd.f32 %v935_v15, %v865_v25  ;;  %v1037_v58 = vmul.f32 %v2607_v39, %v2857_v33  ;;  %v1404_v22 = vld [vmem:[#allocation2 + $0x149] sm:$0xff] }
  0xa5   : > { %v1672_v45 = vadd.f32 %v1640_v53, %v1571_v35  ;;  %v1471_v5 = vadd.f32 %v1439_v0, %v1370_v28  ;;  %v1339_v50 = vmul.f32 %v2640_v18, %v1302_v38  ;;  %v1605_v6 = vld [vmem:[#allocation2 + $0x133] sm:$0xff]  ;;  %v834_v16 = vmul.f32 %v2573_v23, %v897_v46  ;;  %v1505_v47 = vld [vmem:[#allocation2 + $0x14a] sm:$0xff] }
  0xa6   : > { %v1270_v51 = vadd.f32 %v1238_v61, %v1169_v31  ;;  %v1440_v40 = vmul.f32 %v2645_v49, %v1403_v52  ;;  %v1069_v24 = vadd.f32 %v1037_v58, %v967_v29  ;;  %v1138_v41 = vmul.f32 %v2612_v4, %v1101_v63  ;;  %v2873_v48 = vld [vmem:[#allocation2 + $0x1b0] sm:$0xff]  ;;  %v2888_v63 = vld [vmem:[#allocation2 + $0x1c8] sm:$0xff] }
  0xa7   : > { %1704 = vst.msk [vmem:[%s2710_s6 + $0x58] sm:$0xff] %vm309_vm0, %v1672_v45  ;;  %v1572_v1 = vadd.f32 %v1540_v7, %v1471_v5  ;;  %v1541_v53 = vmul.f32 %v2659_v17, %v1504_v14  ;;  %v866_v13 = vadd.f32 %v834_v16, %v3261_v34  ;;  %v936_v46 = vmul.f32 %v2588_v9, %v2843_v20  ;;  %v1102_v43 = vld [vmem:[#allocation2 + $0x14d] sm:$0xff]  ;;  %v3262_v14 = vld [vmem:[#allocation19_spill] sm:$0xff] }
  0xa8   : > { %v1371_v36 = vadd.f32 %v1339_v50, %v1270_v51  ;;  %v1642_v12 = vmul.f32 %v2664_v19, %v1605_v6  ;;  %v1170_v54 = vadd.f32 %v1138_v41, %v1069_v24  ;;  %v1239_v55 = vmul.f32 %v2635_v27, %v1202_v10  ;;  %v1606_v56 = vld [vmem:[#allocation2 + $0x14b] sm:$0xff] }
  0xa9   : > { %v1673_v0 = vadd.f32 %v1641_v26, %v1572_v1  ;;  %v968_v44 = vadd.f32 %v936_v46, %v866_v13  ;;  %v1038_v38 = vmul.f32 %v2607_v39, %v2873_v48  ;;  %v835_v25 = vmul.f32 %v2573_v23, %v898_v32  ;;  %v1203_v52 = vld [vmem:[#allocation2 + $0x14e] sm:$0xff]  ;;  %v1103_v10 = vld [vmem:[#allocation2 + $0x165] sm:$0xff] }
  0xaa   : > { %v1472_v15 = vadd.f32 %v1440_v40, %v1371_v36  ;;  %v1271_v35 = vadd.f32 %v1239_v55, %v1170_v54  ;;  %v1340_v28 = vmul.f32 %v2640_v18, %v1303_v2  ;;  %v1441_v7 = vmul.f32 %v2645_v49, %v1404_v22  ;;  %v1304_v61 = vld [vmem:[#allocation2 + $0x14f] sm:$0xff]  ;;  %v1204_v34 = vld [vmem:[#allocation2 + $0x166] sm:$0xff] }
  0xab   : > { %1705 = vst.msk [vmem:[%s2710_s6 + $0x60] sm:$0xff] %vm309_vm0, %v1673_v0  ;;  %v1070_v26 = vadd.f32 %v1038_v38, %v968_v44  ;;  %v1139_v31 = vmul.f32 %v2612_v4, %v1102_v43  ;;  %v867_v29 = vadd.f32 %v835_v25, %v3262_v14  ;;  %v937_v32 = vmul.f32 %v2588_v9, %v2857_v33  ;;  %v1405_v6 = vld [vmem:[#allocation2 + $0x151] sm:$0xff] }
  0xac   : > { %v1573_v58 = vadd.f32 %v1541_v53, %v1472_v15  ;;  %v1372_v45 = vadd.f32 %v1340_v28, %v1271_v35  ;;  %v1542_v5 = vmul.f32 %v2659_v17, %v1505_v47  ;;  %v1643_v50 = vmul.f32 %v2664_v19, %v1606_v56  ;;  %v1506_v40 = vld [vmem:[#allocation2 + $0x152] sm:$0xff]  ;;  %v1305_v47 = vld [vmem:[#allocation2 + $0x167] sm:$0xff] }
  0xad   : > { %v1171_v16 = vadd.f32 %v1139_v31, %v1070_v26  ;;  %v1240_v51 = vmul.f32 %v2635_v27, %v1203_v52  ;;  %v969_v24 = vadd.f32 %v937_v32, %v867_v29  ;;  %v1039_v41 = vmul.f32 %v2607_v39, %v2888_v63  ;;  %v1607_v22 = vld [vmem:[#allocation2 + $0x153] sm:$0xff]  ;;  %v1406_v56 = vld [vmem:[#allocation2 + $0x169] sm:$0xff] }
  0xae   : > { %v1674_v1 = vadd.f32 %v1642_v12, %v1573_v58  ;;  %v1473_v2 = vadd.f32 %v1441_v7, %v1372_v45  ;;  %v1341_v53 = vmul.f32 %v2640_v18, %v1304_v61  ;;  %v836_v13 = vmul.f32 %v2573_v23, %v2843_v20  ;;  %v2906_v43 = vld [vmem:[#allocation2 + $0x1d0] sm:$0xff] }
  0xaf   : > { %v1272_v46 = vadd.f32 %v1240_v51, %v1171_v16  ;;  %v1442_v36 = vmul.f32 %v2645_v49, %v1405_v6  ;;  %v1071_v54 = vadd.f32 %v1039_v41, %v969_v24  ;;  %v1140_v55 = vmul.f32 %v2612_v4, %v1103_v10  ;;  %v3263_v44 = vld [vmem:[#allocation21_spill] sm:$0xff]  ;;  %v2922_v10 = vld [vmem:[#allocation2 + $0x1e8] sm:$0xff] }
  0xb0   : > { %1706 = vst.msk [vmem:[%s2710_s6 + $0x68] sm:$0xff] %vm309_vm0, %v1674_v1  ;;  %v1574_v0 = vadd.f32 %v1542_v5, %v1473_v2  ;;  %v1543_v12 = vmul.f32 %v2659_v17, %v1506_v40  ;;  %v868_v38 = vadd.f32 %v836_v13, %v3263_v44  ;;  %v938_v20 = vmul.f32 %v2588_v9, %v2873_v48  ;;  %v1104_v7 = vld [vmem:[#allocation2 + $0x16d] sm:$0xff]  ;;  %v3264_v40 = vld [vmem:[#allocation22_spill] sm:$0xff] }
  0xb1   : > { %v1373_v25 = vadd.f32 %v1341_v53, %v1272_v46  ;;  %v1644_v15 = vmul.f32 %v2664_v19, %v1607_v22  ;;  %v1172_v35 = vadd.f32 %v1140_v55, %v1071_v54  ;;  %v1241_v28 = vmul.f32 %v2635_v27, %v1204_v34  ;;  %v1507_v26 = vld [vmem:[#allocation2 + $0x16a] sm:$0xff] }
  0xb2   : > { %v1675_v52 = vadd.f32 %v1643_v50, %v1574_v0  ;;  %v1608_v31 = vld [vmem:[#allocation2 + $0x16b] sm:$0xff]  ;;  %v970_v61 = vadd.f32 %v938_v20, %v868_v38  ;;  %v1040_v14 = vmul.f32 %v2607_v39, %v2906_v43  ;;  %v837_v29 = vmul.f32 %v2573_v23, %v2857_v33 }
  0xb3   : > { %v1474_v32 = vadd.f32 %v1442_v36, %v1373_v25  ;;  %v1273_v58 = vadd.f32 %v1241_v28, %v1172_v35  ;;  %v1342_v45 = vmul.f32 %v2640_v18, %v1305_v47  ;;  %v1443_v5 = vmul.f32 %v2645_v49, %v1406_v56  ;;  %v1205_v6 = vld [vmem:[#allocation2 + $0x16e] sm:$0xff]  ;;  %v1105_v34 = vld [vmem:[#allocation2 + $0x185] sm:$0xff] }
  0xb4   : > { %1707 = vst.msk [vmem:[%s2710_s6 + $0x70] sm:$0xff] %vm309_vm0, %v1675_v52  ;;  %v1072_v50 = vadd.f32 %v1040_v14, %v970_v61  ;;  %v1141_v16 = vmul.f32 %v2612_v4, %v1104_v7  ;;  %v1306_v51 = vld [vmem:[#allocation2 + $0x16f] sm:$0xff]  ;;  %v869_v24 = vadd.f32 %v837_v29, %v3264_v40  ;;  %v939_v33 = vmul.f32 %v2588_v9, %v2888_v63  ;;  %v1206_v44 = vld [vmem:[#allocation2 + $0x186] sm:$0xff]  ;;  %v2955_v40 = vld [vmem:[%s3202_s0 + $0x4] ss:$0 sm:$0xff] }
  0xb5   : > { %v1575_v41 = vadd.f32 %v1543_v12, %v1474_v32  ;;  %v1374_v1 = vadd.f32 %v1342_v45, %v1273_v58  ;;  %v1544_v2 = vmul.f32 %v2659_v17, %v1507_v26  ;;  %v1645_v53 = vmul.f32 %v2664_v19, %v1608_v31  ;;  %v1407_v22 = vld [vmem:[#allocation2 + $0x171] sm:$0xff]  ;;  %v1307_v26 = vld [vmem:[#allocation2 + $0x187] sm:$0xff] }
  0xb6   : > { %v1173_v13 = vadd.f32 %v1141_v16, %v1072_v50  ;;  %v1242_v46 = vmul.f32 %v2635_v27, %v1205_v6  ;;  %v1508_v36 = vld [vmem:[#allocation2 + $0x172] sm:$0xff]  ;;  %v971_v54 = vadd.f32 %v939_v33, %v869_v24  ;;  %v1041_v55 = vmul.f32 %v2607_v39, %v2922_v10  ;;  %v1408_v31 = vld [vmem:[#allocation2 + $0x189] sm:$0xff]  ;;  %v3265_v61 = vld [vmem:[#allocation23_spill] sm:$0xff] }
  0xb7   : > { %v1676_v0 = vadd.f32 %v1644_v15, %v1575_v41  ;;  %v1475_v47 = vadd.f32 %v1443_v5, %v1374_v1  ;;  %v1343_v12 = vmul.f32 %v2640_v18, %v1306_v51  ;;  %v1609_v56 = vld [vmem:[#allocation2 + $0x173] sm:$0xff]  ;;  %v838_v38 = vmul.f32 %v2573_v23, %v2873_v48  ;;  %v1509_v6 = vld [vmem:[#allocation2 + $0x18a] sm:$0xff] }
  0xb8   : > { %v1274_v20 = vadd.f32 %v1242_v46, %v1173_v13  ;;  %v1444_v25 = vmul.f32 %v2645_v49, %v1407_v22  ;;  %v1073_v35 = vadd.f32 %v1041_v55, %v971_v54  ;;  %v1142_v28 = vmul.f32 %v2612_v4, %v1105_v34  ;;  %v2940_v7 = vld [vmem:[#allocation2 + $0x1f0] sm:$0xff]  ;;  %v3266_v13 = vld [vmem:[#allocation24_spill] sm:$0xff] }
  0xb9   : > { %1708 = vst.msk [vmem:[%s2710_s6 + $0x78] sm:$0xff] %vm309_vm0, %v1676_v0  ;;  %v1576_v52 = vadd.f32 %v1544_v2, %v1475_v47  ;;  %v1545_v15 = vmul.f32 %v2659_v17, %v1508_v36  ;;  %v870_v14 = vadd.f32 %v838_v38, %v3265_v61  ;;  %v940_v23 = vmul.f32 %v2588_v9, %v2906_v43  ;;  %v1106_v45 = vld [vmem:[#allocation2 + $0x18d] sm:$0xff]  ;;  %v1107_v47 = vld [vmem:[#allocation2 + $0x1a5] sm:$0xff] }
  0xba   : > { %v1375_v48 = vadd.f32 %v1343_v12, %v1274_v20  ;;  %v1646_v29 = vmul.f32 %v2664_v19, %v1609_v56  ;;  %v1174_v32 = vadd.f32 %v1142_v28, %v1073_v35  ;;  %v1243_v58 = vmul.f32 %v2635_v27, %v1206_v44  ;;  %v1610_v50 = vld [vmem:[#allocation2 + $0x18b] sm:$0xff]  ;;  %v2980_v38 = vld [vmem:[%s3202_s0 + $0x6] ss:$0 sm:$0xff]  ;;  %v1611_v28 = vld [vmem:[#allocation2 + $0x193] sm:$0xff] }
  0xbb   : > { %v1677_v5 = vadd.f32 %v1645_v53, %v1576_v52  ;;  %v972_v16 = vadd.f32 %v940_v23, %v870_v14  ;;  %v1042_v51 = vmul.f32 %v2607_v39, %v2940_v7  ;;  %v839_v9 = vmul.f32 %v2955_v40, %v2888_v63  ;;  %v1207_v2 = vld [vmem:[#allocation2 + $0x18e] sm:$0xff]  ;;  %v2970_v63 = vld [vmem:[%s3202_s0 + $0x5] ss:$0 sm:$0xff]  ;;  %v1208_v52 = vld [vmem:[#allocation2 + $0x1a6] sm:$0xff] }
  0xbc   : > { %v1476_v24 = vadd.f32 %v1444_v25, %v1375_v48  ;;  %v1275_v33 = vadd.f32 %v1243_v58, %v1174_v32  ;;  %v1344_v41 = vmul.f32 %v2640_v18, %v1307_v26  ;;  %v1445_v1 = vmul.f32 %v2645_v49, %v1408_v31  ;;  %v2961_v53 = vld [vmem:[#allocation2 + $0x208] sm:$0xff]  ;;  %v1409_v0 = vld [vmem:[#allocation2 + $0x191] sm:$0xff]  ;;  %v2995_v31 = vld [vmem:[%s3203_s1 + $0x3] ss:$0 sm:$0xff] }
  0xbd   : > { %1709 = vst.msk [vmem:[%s2710_s6 + $0x80] sm:$0xff] %vm309_vm0, %v1677_v5  ;;  %v1074_v39 = vadd.f32 %v1042_v51, %v972_v16  ;;  %v1143_v22 = vmul.f32 %v2612_v4, %v1106_v45  ;;  %v1308_v34 = vld [vmem:[#allocation2 + $0x18f] sm:$0xff]  ;;  %v871_v46 = vadd.f32 %v839_v9, %v3266_v13  ;;  %v941_v18 = vmul.f32 %v2970_v63, %v2922_v10  ;;  %v3001_v23 = vld [vmem:[%s3203_s1] ss:$0 sm:$0xff]  ;;  %v1309_v58 = vld [vmem:[#allocation2 + $0x1a7] sm:$0xff] }
  0xbe   : > { %v1577_v49 = vadd.f32 %v1545_v15, %v1476_v24  ;;  %v1376_v36 = vadd.f32 %v1344_v41, %v1275_v33  ;;  %v1546_v54 = vmul.f32 %v2659_v17, %v1509_v6  ;;  %v1647_v55 = vmul.f32 %v2664_v19, %v1610_v50  ;;  %v1510_v56 = vld [vmem:[#allocation2 + $0x192] sm:$0xff]  ;;  %v2987_v19 = vld [vmem:[%s3203_s1 + $0x2] ss:$0 sm:$0xff]  ;;  %v1410_v45 = vld [vmem:[#allocation2 + $0x1a9] sm:$0xff] }
  0xbf   : > { %v1175_v4 = vadd.f32 %v1143_v22, %v1074_v39  ;;  %v1244_v12 = vmul.f32 %v2635_v27, %v1207_v2  ;;  %v973_v44 = vadd.f32 %v941_v18, %v871_v46  ;;  %v1043_v20 = vmul.f32 %v2980_v38, %v2961_v53  ;;  %v3015_v16 = vld [vmem:[%s3203_s1 + $0x5] ss:$0 sm:$0xff]  ;;  %v1108_v24 = vld [vmem:[#allocation2 + $0x1ad] sm:$0xff] }
  0xc0   : > { %v1678_v25 = vadd.f32 %v1646_v29, %v1577_v49  ;;  %v1477_v35 = vadd.f32 %v1445_v1, %v1376_v36  ;;  %v1345_v27 = vmul.f32 %v2987_v19, %v1308_v34  ;;  %v840_v15 = vmul.f32 %v2955_v40, %v2906_v43  ;;  %v3004_v29 = vld [vmem:[#allocation2 + $0x210] sm:$0xff]  ;;  %v3030_v36 = vld [vmem:[#allocation2 + $0x228] sm:$0xff] }
  0xc1   : > { %v1276_v26 = vadd.f32 %v1244_v12, %v1175_v4  ;;  %v1446_v61 = vmul.f32 %v2995_v31, %v1409_v0  ;;  %v1075_v14 = vadd.f32 %v1043_v20, %v973_v44  ;;  %v1144_v48 = vmul.f32 %v3001_v23, %v1107_v47  ;;  %v1511_v41 = vld [vmem:[#allocation2 + $0x1aa] sm:$0xff] }
  0xc2   : > { %1710 = vst.msk [vmem:[%s2710_s6 + $0x88] sm:$0xff] %vm309_vm0, %v1678_v25  ;;  %v1578_v43 = vadd.f32 %v1546_v54, %v1477_v35  ;;  %v1547_v32 = vmul.f32 %v2659_v17, %v1510_v56  ;;  %v872_v5 = vadd.f32 %v840_v15, %v2520_v3  ;;  %v942_v6 = vmul.f32 %v2970_v63, %v2940_v7  ;;  %v3021_v17 = vld [vmem:[%s3203_s1 + $0x1] ss:$0 sm:$0xff]  ;;  %v1612_v1 = vld [vmem:[#allocation2 + $0x1ab] sm:$0xff]  ;;  %v3041_v56 = vld [vmem:[%s3203_s1 + $0x4] ss:$0 sm:$0xff] }
  0xc3   : > { %v1377_v50 = vadd.f32 %v1345_v27, %v1276_v26  ;;  %v1648_v51 = vmul.f32 %v3015_v16, %v1611_v28  ;;  %v1176_v9 = vadd.f32 %v1144_v48, %v1075_v14  ;;  %v1245_v3 = vmul.f32 %v3021_v17, %v1208_v52  ;;  %v1209_v49 = vld [vmem:[#allocation2 + $0x1ae] sm:$0xff]  ;;  %v1109_v35 = vld [vmem:[#allocation2 + $0x1c5] sm:$0xff] }
  0xc4   : > { %v1679_v33 = vadd.f32 %v1647_v55, %v1578_v43  ;;  %v974_v2 = vadd.f32 %v942_v6, %v872_v5  ;;  %v1044_v39 = vmul.f32 %v2980_v38, %v3004_v29  ;;  %v841_v22 = vmul.f32 %v2955_v40, %v2922_v10  ;;  %v1310_v0 = vld [vmem:[#allocation2 + $0x1af] sm:$0xff]  ;;  %v1210_v43 = vld [vmem:[#allocation2 + $0x1c6] sm:$0xff] }
  0xc5   : > { %v1478_v34 = vadd.f32 %v1446_v61, %v1377_v50  ;;  %v1277_v13 = vadd.f32 %v1245_v3, %v1176_v9  ;;  %v1346_v46 = vmul.f32 %v2987_v19, %v1309_v58  ;;  %v1447_v18 = vmul.f32 %v2995_v31, %v1410_v45  ;;  %v1411_v25 = vld [vmem:[#allocation2 + $0x1b1] sm:$0xff]  ;;  %v1311_v3 = vld [vmem:[#allocation2 + $0x1c7] sm:$0xff] }
  0xc6   : > { %1711 = vst.msk [vmem:[%s2710_s6 + $0x90] sm:$0xff] %vm309_vm0, %v1679_v33  ;;  %v1076_v54 = vadd.f32 %v1044_v39, %v974_v2  ;;  %v1145_v55 = vmul.f32 %v3001_v23, %v1108_v24  ;;  %v873_v47 = vadd.f32 %v841_v22, %v2530_v8  ;;  %v943_v10 = vmul.f32 %v2970_v63, %v2961_v53  ;;  %v1512_v28 = vld [vmem:[#allocation2 + $0x1b2] sm:$0xff]  ;;  %v1412_v24 = vld [vmem:[#allocation2 + $0x1c9] sm:$0xff] }
  0xc7   : > { %v1579_v4 = vadd.f32 %v1547_v32, %v1478_v34  ;;  %v1378_v12 = vadd.f32 %v1346_v46, %v1277_v13  ;;  %v1548_v44 = vmul.f32 %v3041_v56, %v1511_v41  ;;  %v1649_v20 = vmul.f32 %v3015_v16, %v1612_v1  ;;  %v1613_v48 = vld [vmem:[#allocation2 + $0x1b3] sm:$0xff]  ;;  %v1513_v13 = vld [vmem:[#allocation2 + $0x1ca] sm:$0xff] }
  0xc8   : > { %v1177_v27 = vadd.f32 %v1145_v55, %v1076_v54  ;;  %v1246_v8 = vmul.f32 %v3021_v17, %v1209_v49  ;;  %v975_v52 = vadd.f32 %v943_v10, %v873_v47  ;;  %v1045_v15 = vmul.f32 %v2980_v38, %v3030_v36  ;;  %v3053_v50 = vld [vmem:[#allocation2 + $0x230] sm:$0xff] }
  0xc9   : > { %v1680_v26 = vadd.f32 %v1648_v51, %v1579_v4  ;;  %v1479_v61 = vadd.f32 %v1447_v18, %v1378_v12  ;;  %v1347_v14 = vmul.f32 %v2987_v19, %v1310_v0  ;;  %v842_v32 = vmul.f32 %v2955_v40, %v2940_v7  ;;  %v1110_v22 = vld [vmem:[#allocation2 + $0x1cd] sm:$0xff] }
  0xca   : > { %v1278_v58 = vadd.f32 %v1246_v8, %v1177_v27  ;;  %v1448_v45 = vmul.f32 %v2995_v31, %v1411_v25  ;;  %v1077_v5 = vadd.f32 %v1045_v15, %v975_v52  ;;  %v1146_v6 = vmul.f32 %v3001_v23, %v1109_v35  ;;  %v1614_v46 = vld [vmem:[#allocation2 + $0x1cb] sm:$0xff] }
  0xcb   : > { %1712 = vst.msk [vmem:[%s2710_s6 + $0x98] sm:$0xff] %vm309_vm0, %v1680_v26  ;;  %v1580_v9 = vadd.f32 %v1548_v44, %v1479_v61  ;;  %v1549_v51 = vmul.f32 %v3041_v56, %v1512_v28  ;;  %v874_v33 = vadd.f32 %v842_v32, %v2536_v11  ;;  %v944_v7 = vmul.f32 %v2970_v63, %v3004_v29  ;;  %v1211_v10 = vld [vmem:[#allocation2 + $0x1ce] sm:$0xff]  ;;  %v1111_v15 = vld [vmem:[#allocation2 + $0x1e5] sm:$0xff] }
  0xcc   : > { %v1379_v41 = vadd.f32 %v1347_v14, %v1278_v58  ;;  %v1650_v1 = vmul.f32 %v3015_v16, %v1613_v48  ;;  %v1178_v2 = vadd.f32 %v1146_v6, %v1077_v5  ;;  %v1247_v39 = vmul.f32 %v3021_v17, %v1210_v43  ;;  %v3069_v4 = vld [vmem:[#allocation2 + $0x248] sm:$0xff]  ;;  %v1413_v52 = vld [vmem:[#allocation2 + $0x1d1] sm:$0xff] }
  0xcd   : > { %v1681_v34 = vadd.f32 %v1649_v20, %v1580_v9  ;;  %v976_v18 = vadd.f32 %v944_v7, %v874_v33  ;;  %v1046_v49 = vmul.f32 %v2980_v38, %v3053_v50  ;;  %v843_v11 = vmul.f32 %v2955_v40, %v2961_v53  ;;  %v1312_v20 = vld [vmem:[#allocation2 + $0x1cf] sm:$0xff]  ;;  %v1212_v5 = vld [vmem:[#allocation2 + $0x1e6] sm:$0xff] }
  0xce   : > { %v1480_v54 = vadd.f32 %v1448_v45, %v1379_v41  ;;  %v1279_v55 = vadd.f32 %v1247_v39, %v1178_v2  ;;  %v1348_v0 = vmul.f32 %v2987_v19, %v1311_v3  ;;  %v1449_v47 = vmul.f32 %v2995_v31, %v1412_v24  ;;  %v1514_v14 = vld [vmem:[#allocation2 + $0x1d2] sm:$0xff]  ;;  %v1414_v2 = vld [vmem:[#allocation2 + $0x1e9] sm:$0xff] }
  0xcf   : > { %1713 = vst.msk [vmem:[%s2710_s6 + $0xa0] sm:$0xff] %vm309_vm0, %v1681_v34  ;;  %v1078_v12 = vadd.f32 %v1046_v49, %v976_v18  ;;  %v1147_v44 = vmul.f32 %v3001_v23, %v1110_v22  ;;  %v875_v25 = vadd.f32 %v843_v11, %v2544_v60  ;;  %v945_v53 = vmul.f32 %v2970_v63, %v3030_v36  ;;  %v1615_v45 = vld [vmem:[#allocation2 + $0x1d3] sm:$0xff]  ;;  %v1515_v11 = vld [vmem:[#allocation2 + $0x1ea] sm:$0xff] }
  0xd0   : > { %v1581_v35 = vadd.f32 %v1549_v51, %v1480_v54  ;;  %v1380_v27 = vadd.f32 %v1348_v0, %v1279_v55  ;;  %v1550_v8 = vmul.f32 %v3041_v56, %v1513_v13  ;;  %v1651_v28 = vmul.f32 %v3015_v16, %v1614_v46  ;;  %v3087_v33 = vld [vmem:[#allocation2 + $0x250] sm:$0xff] }
  0xd1   : > { %v1179_v26 = vadd.f32 %v1147_v44, %v1078_v12  ;;  %v1248_v61 = vmul.f32 %v3021_v17, %v1211_v10  ;;  %v977_v48 = vadd.f32 %v945_v53, %v875_v25  ;;  %v1047_v60 = vmul.f32 %v2980_v38, %v3069_v4  ;;  %v1112_v18 = vld [vmem:[#allocation2 + $0x1ed] sm:$0xff] }
  0xd2   : > { %v1682_v43 = vadd.f32 %v1650_v1, %v1581_v35  ;;  %v1481_v32 = vadd.f32 %v1449_v47, %v1380_v27  ;;  %v1349_v58 = vmul.f32 %v2987_v19, %v1312_v20  ;;  %v844_v6 = vmul.f32 %v2955_v40, %v3004_v29  ;;  %v1313_v1 = vld [vmem:[#allocation2 + $0x1e7] sm:$0xff]  ;;  %v1314_v27 = vld [vmem:[#allocation2 + $0x1ef] sm:$0xff] }
  0xd3   : > { %v1280_v9 = vadd.f32 %v1248_v61, %v1179_v26  ;;  %v1450_v51 = vmul.f32 %v2995_v31, %v1413_v52  ;;  %v1079_v3 = vadd.f32 %v1047_v60, %v977_v48  ;;  %v1148_v24 = vmul.f32 %v3001_v23, %v1111_v15  ;;  %v1616_v54 = vld [vmem:[#allocation2 + $0x1eb] sm:$0xff] }
  0xd4   : > { %1714 = vst.msk [vmem:[%s2710_s6 + $0xa8] sm:$0xff] %vm309_vm0, %v1682_v43  ;;  %v1582_v7 = vadd.f32 %v1550_v8, %v1481_v32  ;;  %v1551_v41 = vmul.f32 %v3041_v56, %v1514_v14  ;;  %v876_v39 = vadd.f32 %v844_v6, %v2552_v42  ;;  %v946_v29 = vmul.f32 %v2970_v63, %v3053_v50  ;;  %v1213_v20 = vld [vmem:[#allocation2 + $0x1ee] sm:$0xff]  ;;  %v1113_v14 = vld [vmem:[#allocation2 + $0x205] sm:$0xff] }
  0xd5   : > { %v1381_v22 = vadd.f32 %v1349_v58, %v1280_v9  ;;  %v1652_v34 = vmul.f32 %v3015_v16, %v1615_v45  ;;  %v1180_v13 = vadd.f32 %v1148_v24, %v1079_v3  ;;  %v1249_v46 = vmul.f32 %v3021_v17, %v1212_v5  ;;  %v1012_v25 = vld [vmem:[#allocation2 + $0x268] sm:$0xff]  ;;  %v1415_v61 = vld [vmem:[#allocation2 + $0x1f1] sm:$0xff] }
  0xd6   : > { %v1683_v49 = vadd.f32 %v1651_v28, %v1582_v7  ;;  %v978_v55 = vadd.f32 %v946_v29, %v876_v39  ;;  %v1048_v0 = vmul.f32 %v2980_v38, %v3087_v33  ;;  %v845_v42 = vmul.f32 %v2955_v40, %v3030_v36  ;;  %v1516_v43 = vld [vmem:[#allocation2 + $0x1f2] sm:$0xff]  ;;  %v1214_v9 = vld [vmem:[#allocation2 + $0x206] sm:$0xff] }
  0xd7   : > { %v1482_v47 = vadd.f32 %v1450_v51, %v1381_v22  ;;  %v1281_v10 = vadd.f32 %v1249_v46, %v1180_v13  ;;  %v1350_v12 = vmul.f32 %v2987_v19, %v1313_v1  ;;  %v1451_v44 = vmul.f32 %v2995_v31, %v1414_v2  ;;  %v1617_v6 = vld [vmem:[#allocation2 + $0x1f3] sm:$0xff]  ;;  %v1315_v29 = vld [vmem:[#allocation2 + $0x207] sm:$0xff] }
  0xd8   : > { %1715 = vst.msk [vmem:[%s2710_s6 + $0xb0] sm:$0xff] %vm309_vm0, %v1683_v49  ;;  %v1080_v53 = vadd.f32 %v1048_v0, %v978_v55  ;;  %v1149_v35 = vmul.f32 %v3001_v23, %v1112_v18  ;;  %v877_v8 = vadd.f32 %v845_v42, %v2560_v21  ;;  %v947_v28 = vmul.f32 %v2970_v63, %v3069_v4  ;;  %v1013_v1 = vld [vmem:[#allocation2 + $0x270] sm:$0xff] }
  0xd9   : > { %v1583_v36 = vadd.f32 %v1551_v41, %v1482_v47  ;;  %v1382_v52 = vadd.f32 %v1350_v12, %v1281_v10  ;;  %v1552_v15 = vmul.f32 %v3041_v56, %v1515_v11  ;;  %v1653_v26 = vmul.f32 %v3015_v16, %v1616_v54  ;;  %v1416_v22 = vld [vmem:[#allocation2 + $0x209] sm:$0xff] }
  0xda   : > { %v1181_v48 = vadd.f32 %v1149_v35, %v1080_v53  ;;  %v1250_v60 = vmul.f32 %v3021_v17, %v1213_v20  ;;  %v979_v32 = vadd.f32 %v947_v28, %v877_v8  ;;  %v1049_v58 = vmul.f32 %v2980_v38, %v1012_v25  ;;  %v1114_v11 = vld [vmem:[#allocation2 + $0x20d] sm:$0xff] }
  0xdb   : > { %v1684_v21 = vadd.f32 %v1652_v34, %v1583_v36  ;;  %v1483_v45 = vadd.f32 %v1451_v44, %v1382_v52  ;;  %v1351_v5 = vmul.f32 %v2987_v19, %v1314_v27  ;;  %v846_v51 = vmul.f32 %v2955_v40, %v3053_v50  ;;  %v1517_v55 = vld [vmem:[#allocation2 + $0x20a] sm:$0xff] }
  0xdc   : > { %v1282_v3 = vadd.f32 %v1250_v60, %v1181_v48  ;;  %v1452_v24 = vmul.f32 %v2995_v31, %v1415_v61  ;;  %v1081_v7 = vadd.f32 %v1049_v58, %v979_v32  ;;  %v1150_v41 = vmul.f32 %v3001_v23, %v1113_v14  ;;  %v1618_v0 = vld [vmem:[#allocation2 + $0x20b] sm:$0xff] }
  0xdd   : > { %1716 = vst.msk [vmem:[%s2710_s6 + $0xb8] sm:$0xff] %vm309_vm0, %v1684_v21  ;;  %v1584_v2 = vadd.f32 %v1552_v15, %v1483_v45  ;;  %v1553_v39 = vmul.f32 %v3041_v56, %v1516_v43  ;;  %v878_v34 = vadd.f32 %v846_v51, %v2577_v37  ;;  %v948_v13 = vmul.f32 %v2970_v63, %v3087_v33  ;;  %v1215_v53 = vld [vmem:[#allocation2 + $0x20e] sm:$0xff]  ;;  %v1115_v48 = vld [vmem:[#allocation2 + $0x225] sm:$0xff] }
  0xde   : > { %v1383_v50 = vadd.f32 %v1351_v5, %v1282_v3  ;;  %v1654_v46 = vmul.f32 %v3015_v16, %v1617_v6  ;;  %v1182_v18 = vadd.f32 %v1150_v41, %v1081_v7  ;;  %v1251_v49 = vmul.f32 %v3021_v17, %v1214_v9  ;;  %v1014_v35 = vld [vmem:[#allocation2 + $0x288] sm:$0xff]  ;;  %v1417_v14 = vld [vmem:[#allocation2 + $0x211] sm:$0xff] }
  0xdf   : > { %v1685_v54 = vadd.f32 %v1653_v26, %v1584_v2  ;;  %v980_v42 = vadd.f32 %v948_v13, %v878_v34  ;;  %v1050_v47 = vmul.f32 %v2980_v38, %v1013_v1  ;;  %v847_v37 = vmul.f32 %v2955_v40, %v3069_v4  ;;  %v1316_v28 = vld [vmem:[#allocation2 + $0x20f] sm:$0xff]  ;;  %v1216_v6 = vld [vmem:[#allocation2 + $0x226] sm:$0xff] }
  0xe0   : > { %v1484_v10 = vadd.f32 %v1452_v24, %v1383_v50  ;;  %v1283_v12 = vadd.f32 %v1251_v49, %v1182_v18  ;;  %v1352_v44 = vmul.f32 %v2987_v19, %v1315_v29  ;;  %v1453_v20 = vmul.f32 %v2995_v31, %v1416_v22  ;;  %v1518_v32 = vld [vmem:[#allocation2 + $0x212] sm:$0xff]  ;;  %v1317_v29 = vld [vmem:[#allocation2 + $0x227] sm:$0xff] }
  0xe1   : > { %1717 = vst.msk [vmem:[%s2710_s6 + $0xc0] sm:$0xff] %vm309_vm0, %v1685_v54  ;;  %v1082_v27 = vadd.f32 %v1050_v47, %v980_v42  ;;  %v1151_v8 = vmul.f32 %v3001_v23, %v1114_v11  ;;  %v879_v36 = vadd.f32 %v847_v37, %v2581_v57  ;;  %v949_v52 = vmul.f32 %v2970_v63, %v1012_v25  ;;  %v1619_v5 = vld [vmem:[#allocation2 + $0x213] sm:$0xff]  ;;  %v1016_v13 = vld [vmem:[#allocation2 + $0x2a8] sm:$0xff] }
  0xe2   : > { %v1585_v15 = vadd.f32 %v1553_v39, %v1484_v10  ;;  %v1384_v4 = vadd.f32 %v1352_v44, %v1283_v12  ;;  %v1554_v26 = vmul.f32 %v3041_v56, %v1517_v55  ;;  %v1655_v61 = vmul.f32 %v3015_v16, %v1618_v0  ;;  %v1015_v41 = vld [vmem:[#allocation2 + $0x290] sm:$0xff]  ;;  %v1117_v12 = vld [vmem:[#allocation2 + $0x245] sm:$0xff] }
  0xe3   : > { %v1183_v60 = vadd.f32 %v1151_v8, %v1082_v27  ;;  %v1252_v43 = vmul.f32 %v3021_v17, %v1215_v53  ;;  %v981_v58 = vadd.f32 %v949_v52, %v879_v36  ;;  %v1051_v21 = vmul.f32 %v2980_v38, %v1014_v35  ;;  %v1418_v18 = vld [vmem:[#allocation2 + $0x229] sm:$0xff] }
  0xe4   : > { %v1686_v45 = vadd.f32 %v1654_v46, %v1585_v15  ;;  %v1485_v57 = vadd.f32 %v1453_v20, %v1384_v4  ;;  %v1353_v25 = vmul.f32 %v2987_v19, %v1316_v28  ;;  %v848_v9 = vmul.f32 %v2955_v40, %v3087_v33  ;;  %v1116_v49 = vld [vmem:[#allocation2 + $0x22d] sm:$0xff] }
  0xe5   : > { %v1284_v51 = vadd.f32 %v1252_v43, %v1183_v60  ;;  %v1454_v3 = vmul.f32 %v2995_v31, %v1417_v14  ;;  %v1083_v24 = vadd.f32 %v1051_v21, %v981_v58  ;;  %v1152_v7 = vmul.f32 %v3001_v23, %v1115_v48  ;;  %v1519_v54 = vld [vmem:[#allocation2 + $0x22a] sm:$0xff] }
  0xe6   : > { %1718 = vst.msk [vmem:[%s2710_s6 + $0xc8] sm:$0xff] %vm309_vm0, %v1686_v45  ;;  %v1586_v2 = vadd.f32 %v1554_v26, %v1485_v57  ;;  %v1555_v39 = vmul.f32 %v3041_v56, %v1518_v32  ;;  %v880_v22 = vadd.f32 %v848_v9, %v2602_v62  ;;  %v950_v34 = vmul.f32 %v2970_v63, %v1013_v1  ;;  %v1217_v42 = vld [vmem:[#allocation2 + $0x22e] sm:$0xff]  ;;  %v1218_v4 = vld [vmem:[#allocation2 + $0x246] sm:$0xff] }
  0xe7   : > { %v1385_v50 = vadd.f32 %v1353_v25, %v1284_v51  ;;  %v1656_v40 = vmul.f32 %v3015_v16, %v1619_v5  ;;  %v1184_v33 = vadd.f32 %v1152_v7, %v1083_v24  ;;  %v1253_v46 = vmul.f32 %v3021_v17, %v1216_v6  ;;  %v1318_v27 = vld [vmem:[#allocation2 + $0x22f] sm:$0xff]  ;;  %v1319_v43 = vld [vmem:[#allocation2 + $0x247] sm:$0xff] }
  0xe8   : > { %v1687_v11 = vadd.f32 %v1655_v61, %v1586_v2  ;;  %v982_v55 = vadd.f32 %v950_v34, %v880_v22  ;;  %v1052_v0 = vmul.f32 %v2980_v38, %v1015_v41  ;;  %v951_v62 = vmul.f32 %v2970_v63, %v1014_v35  ;;  %v1017_v28 = vld [vmem:[#allocation2 + $0x2b0] sm:$0xff] }
  0xe9   : > { %v1486_v47 = vadd.f32 %v1454_v3, %v1385_v50  ;;  %v1285_v1 = vadd.f32 %v1253_v46, %v1184_v33  ;;  %v1354_v37 = vmul.f32 %v2987_v19, %v1317_v29  ;;  %v1053_v10 = vmul.f32 %v2980_v38, %v1016_v13  ;;  %v1620_v26 = vld [vmem:[#allocation2 + $0x22b] sm:$0xff] }
  0xea   : > { %1719 = vst.msk [vmem:[%s2710_s6 + $0xd0] sm:$0xff] %vm309_vm0, %v1687_v11  ;;  %v1455_v44 = vmul.f32 %v2995_v31, %v1418_v18  ;;  %v1084_v20 = vadd.f32 %v1052_v0, %v982_v55  ;;  %v1153_v53 = vmul.f32 %v3001_v23, %v1116_v49  ;;  %v983_v8 = vadd.f32 %v951_v62, %v2677_v30  ;;  %v1419_v14 = vld [vmem:[#allocation2 + $0x231] sm:$0xff]  ;;  %v1420_v51 = vld [vmem:[#allocation2 + $0x249] sm:$0xff] }
  0xeb   : > { %v1587_v36 = vadd.f32 %v1555_v39, %v1486_v47  ;;  %v1386_v35 = vadd.f32 %v1354_v37, %v1285_v1  ;;  %v1556_v52 = vmul.f32 %v3041_v56, %v1519_v54  ;;  %v1254_v15 = vmul.f32 %v3021_v17, %v1217_v42  ;;  %v1118_v57 = vld [vmem:[#allocation2 + $0x24d] sm:$0xff] }
  0xec   : > { %v1185_v61 = vadd.f32 %v1153_v53, %v1084_v20  ;;  %v1085_v48 = vadd.f32 %v1053_v10, %v983_v8  ;;  %v1154_v60 = vmul.f32 %v3001_v23, %v1117_v12  ;;  %v952_v32 = vmul.f32 %v2970_v63, %v1015_v41  ;;  %v1520_v5 = vld [vmem:[#allocation2 + $0x232] sm:$0xff]  ;;  %v1521_v22 = vld [vmem:[#allocation2 + $0x24a] sm:$0xff] }
  0xed   : > { %v1688_v58 = vadd.f32 %v1656_v40, %v1587_v36  ;;  %v1487_v30 = vadd.f32 %v1455_v44, %v1386_v35  ;;  %v1355_v21 = vmul.f32 %v2987_v19, %v1318_v27  ;;  %v1054_v45 = vmul.f32 %v2980_v38, %v1017_v28  ;;  %v1219_v2 = vld [vmem:[#allocation2 + $0x24e] sm:$0xff] }
  0xee   : > { %v1286_v25 = vadd.f32 %v1254_v15, %v1185_v61  ;;  %v1186_v6 = vadd.f32 %v1154_v60, %v1085_v48  ;;  %v1255_v9 = vmul.f32 %v3021_v17, %v1218_v4  ;;  %v984_v3 = vadd.f32 %v952_v32, %v2696_v59  ;;  %v1621_v39 = vld [vmem:[#allocation2 + $0x233] sm:$0xff]  ;;  %v1622_v49 = vld [vmem:[#allocation2 + $0x24b] sm:$0xff] }
  0xef   : > { %1720 = vst.msk [vmem:[%s2710_s6 + $0xd8] sm:$0xff] %vm309_vm0, %v1688_v58  ;;  %v1588_v24 = vadd.f32 %v1556_v52, %v1487_v30  ;;  %v1657_v63 = vmul.f32 %v3015_v16, %v1620_v26  ;;  %v1456_v7 = vmul.f32 %v2995_v31, %v1419_v14  ;;  %v1356_v41 = vmul.f32 %v2987_v19, %v1319_v43  ;;  %v1320_v33 = vld [vmem:[#allocation2 + $0x24f] sm:$0xff] }
  0xf0   : > { %v1387_v38 = vadd.f32 %v1355_v21, %v1286_v25  ;;  %v1287_v29 = vadd.f32 %v1255_v9, %v1186_v6  ;;  %v1086_v34 = vadd.f32 %v1054_v45, %v984_v3  ;;  %v1155_v13 = vmul.f32 %v3001_v23, %v1118_v57  ;;  %v1421_v23 = vld [vmem:[#allocation2 + $0x251] sm:$0xff] }
  0xf1   : > { %v1689_v50 = vadd.f32 %v1657_v63, %v1588_v24  ;;  %v1557_v59 = vmul.f32 %v3041_v56, %v1520_v5  ;;  %v1457_v40 = vmul.f32 %v2995_v31, %v1420_v51  ;;  %v1256_v54 = vmul.f32 %v3021_v17, %v1219_v2  ;;  %v1522_v10 = vld [vmem:[#allocation2 + $0x252] sm:$0xff] }
  0xf2   : > { %v1488_v46 = vadd.f32 %v1456_v7, %v1387_v38  ;;  %v1388_v18 = vadd.f32 %v1356_v41, %v1287_v29  ;;  %v1187_v11 = vadd.f32 %v1155_v13, %v1086_v34  ;;  %v1658_v55 = vmul.f32 %v3015_v16, %v1621_v39  ;;  %v1623_v53 = vld [vmem:[#allocation2 + $0x253] sm:$0xff] }
  0xf3   : > { %1721 = vst.msk [vmem:[%s2710_s6 + $0xe0] sm:$0xff] %vm309_vm0, %v1689_v50  ;;  %v1558_v0 = vmul.f32 %v3041_v56, %v1521_v22  ;;  %v1357_v1 = vmul.f32 %v2987_v19, %v1320_v33  ;;  %v1659_v37 = vmul.f32 %v3015_v16, %v1622_v49  ;;  %v1458_v20 = vmul.f32 %v2995_v31, %v1421_v23 }
  0xf4   : > { %v1589_v42 = vadd.f32 %v1557_v59, %v1488_v46  ;;  %v1489_v62 = vadd.f32 %v1457_v40, %v1388_v18  ;;  %v1288_v47 = vadd.f32 %v1256_v54, %v1187_v11  ;;  %v1559_v28 = vmul.f32 %v3041_v56, %v1522_v10 }
  0xf5   : > { %v1660_v19 = vmul.f32 %v3015_v16, %v1623_v53 }
  0xf6   : > { %v1690_v12 = vadd.f32 %v1658_v55, %v1589_v42  ;;  %v1590_v17 = vadd.f32 %v1558_v0, %v1489_v62  ;;  %v1389_v44 = vadd.f32 %v1357_v1, %v1288_v47 }
  0xf8   : > { %1722 = vst.msk [vmem:[%s2710_s6 + $0xe8] sm:$0xff] %vm309_vm0, %v1690_v12  ;;  %v1691_v27 = vadd.f32 %v1659_v37, %v1590_v17  ;;  %v1490_v8 = vadd.f32 %v1458_v20, %v1389_v44 }
  0xfa   : > { %1723 = vst.msk [vmem:[%s2710_s6 + $0xf0] sm:$0xff] %vm309_vm0, %v1691_v27  ;;  %v1591_v36 = vadd.f32 %v1559_v28, %v1490_v8 }
  0xfc   : > { %v1692_v35 = vadd.f32 %v1660_v19, %v1591_v36 }
  0xfe   : > { %1724 = vst.msk [vmem:[%s2710_s6 + $0xf8] sm:$0xff] %vm309_vm0, %v1692_v35 }
  0xff PF: > { %s14_s17 = sadd.s32 1, %s1937_s17   ;;  %s3267_s15 = smov %s1933_s16 }
 0x100   : > { %p11_p5 = scmp.ge.s32.totalorder %s14_s17, 4   ;;  %s3268_s16 = smov %s3270_s18 }
 0x102   :  { %13 = sbr.rel (!%p11_p5) target bundleno = 2 (0x2), region = 82 }

</bundles_post_ra>
